<compile_context>
chip_gen: v7x
topology: tpu7x:2x2x1
jax: 0.10.0
libtpu: 0.0.40
codegen_flags: <defaults>
</compile_context>

<pallas_src>
import functools

import jax
import jax.numpy as jnp
from jax.experimental import pallas as pl
from jax.experimental.pallas import tpu as pltpu


def _downsample_kernel(x_ref, o_ref, *, down_scale: int):
    """Non-overlapping s x s max pool on a (TC, TH, W) tile -> (TC, TH//s, W//s)."""
    tc, th, w = x_ref.shape
    s = down_scale
    oh, ow = th // s, w // s

    x = x_ref[...]                                      # (TC, TH, W), input dtype
    # 1) Reduce H first: the reshape only splits the sublane axis (W stays the lane axis),
    #    so no lane-crossing relayout is needed, and the data shrinks s x before step 2.
    h_red = jnp.max(x.reshape(tc, oh, s, w), axis=2)    # (TC, OH, W)
    # 2) Reduce W on the already s x smaller tensor (the only lane-splitting step).
    o_ref[...] = jnp.max(h_red.reshape(tc, oh, ow, s), axis=3)   # (TC, OH, OW)


def _round_up(x: int, m: int) -> int:
    return (x + m - 1) // m * m


def _divisors(n: int):
    return [d for d in range(1, n + 1) if n % d == 0]


def _padded_tile_bytes(tc: int, th: int, w: int) -> int:
    """Conservative VMEM footprint of a (tc, th, w) tile: 8-sublane / 128-lane padding,
    4 bytes/elem upper bound (covers fp32; over-estimates packed bf16, which is fine)."""
    return tc * _round_up(th, 8) * _round_up(w, 128) * 4


def downsample(x: jnp.ndarray, down_scale: int, *, use_pallas=None) -> jnp.ndarray:
    """Pallas equivalent of DownSample(down_scale)(x) for NCHW x."""
    b, c, h, w = x.shape
    s = int(down_scale)
    assert h % s == 0 and w % s == 0, "non-divisible adaptive pooling not supported"
    oh, ow = h // s, w // s

    if use_pallas is None:
        # Tiny tensors: kernel launch + grid overhead dwarfs the work; let XLA fuse it.
        use_pallas = x.size * x.dtype.itemsize >= (512 << 10)
    if not use_pallas:
        return jnp.max(x.reshape(b, c, oh, s, ow, s), axis=(3, 5))

    n = b * c
    x_flat = x.reshape(n, h, w)

    target = 4 << 20  # ~4 MiB padded input tile: big enough for HBM roofline, small vs VMEM

    # --- choose the H tile (th) ---
    if _padded_tile_bytes(1, h, w) <= target:
        th = h  # whole plane fits -> batch planes instead
    else:
        # Split H. th must be a multiple of 8*s so the input block (mult. of 8 sublanes)
        # and the output block (th//s multiple of 8) both stay BlockSpec-legal.
        cands = [d for d in _divisors(h)
                 if d % (8 * s) == 0 and _padded_tile_bytes(1, d, w) <= target]
        th = max(cands) if cands else h

    # --- choose the plane batch (tc) ---
    if th == h:
        fitting = [d for d in _divisors(n) if _padded_tile_bytes(d, h, w) <= target] or [1]
        # Prefer leaving >= 2 total grid steps so both TensorCores get work on v7x.
        multi = [d for d in fitting if (n // d) * (h // th) >= 2]
        tc = max(multi) if multi else max(fitting)
    else:
        tc = 1

    grid = (n // tc, h // th)
    toh = th // s

    in_bytes = _padded_tile_bytes(tc, th, w)
    out_bytes = _padded_tile_bytes(tc, toh, ow)
    # Double-buffered input + output tiles plus slack; stay well below v7x's 64 MiB VMEM.
    vmem_limit = int(min(max(2 * (in_bytes + out_bytes) + (2 << 20), 16 << 20), 48 << 20))

    kernel = functools.partial(_downsample_kernel, down_scale=s)

    out_flat = pl.pallas_call(
        kernel,
        out_shape=jax.ShapeDtypeStruct((n, oh, ow), x.dtype),
        grid_spec=pltpu.PrefetchScalarGridSpec(
            num_scalar_prefetch=0,
            grid=grid,
            in_specs=[pl.BlockSpec((tc, th, w), lambda i, j: (i, j, 0))],
            out_specs=pl.BlockSpec((tc, toh, ow), lambda i, j: (i, j, 0)),
        ),
        compiler_params=pltpu.CompilerParams(
            dimension_semantics=("parallel", "parallel"),
            vmem_limit_bytes=vmem_limit,
        ),
    )(x_flat)

    return out_flat.reshape(b, c, oh, ow)


def _reference(x: jnp.ndarray, down_scale: int) -> jnp.ndarray:
    b, c, h, w = x.shape
    s = down_scale
    oh, ow = h // s, w // s
    return jnp.max(x.reshape(b, c, oh, s, ow, s), axis=(3, 5))


if __name__ == "__main__":
    # DownSample has no learnable parameters; only the down_scale hyperparameter.
    key = jax.random.PRNGKey(0)

    # Primary small test at module-scale shapes. Force the Pallas path so the kernel
    # itself is exercised (the auto path would take the tiny-input jnp fallback).
    x = jax.random.normal(key, (2, 4, 16, 16), dtype=jnp.float32)
    out = downsample(x, 2, use_pallas=True)
    jax.block_until_ready(out)
    ref = _reference(x, 2)
    assert out.shape == (2, 4, 8, 8), out.shape
    assert jnp.allclose(out, ref), "mismatch vs reference adaptive max pool"

    # Larger shape: exercises multi-plane (TC > 1) batching and a lane-dense W.
    x2 = jax.random.normal(jax.random.PRNGKey(1), (2, 8, 32, 128), dtype=jnp.float32)
    out2 = downsample(x2, 2, use_pallas=True)
    jax.block_until_ready(out2)
    assert jnp.allclose(out2, _reference(x2, 2)), "mismatch on larger shape"

    # Different down_scale (s=4) on the same tensor.
    out3 = downsample(x2, 4, use_pallas=True)
    jax.block_until_ready(out3)
    assert out3.shape == (2, 8, 8, 32), out3.shape
    assert jnp.allclose(out3, _reference(x2, 4)), "mismatch on down_scale=4"

    # Auto-dispatch path (tiny input -> fused jnp fallback).
    out4 = downsample(x, 2)
    jax.block_until_ready(out4)
    assert jnp.allclose(out4, ref), "mismatch on fallback path"

    print("KERNEL_OK")
</pallas_src>

<mosaic_0001>
module attributes {stable_mosaic.version = 11 : i64} {
  func.func @_downsample_kernel(%arg0: i32, %arg1: i32, %arg2: memref<4x16x16xf32, #tpu.memory_space<vmem>>, %arg3: memref<4x8x8xf32, #tpu.memory_space<vmem>>) attributes {dimension_semantics = [#tpu.dimension_semantics<parallel>, #tpu.dimension_semantics<parallel>], iteration_bounds = array<i64: 2, 1>, scalar_prefetch = 0 : i64, scratch_operands = 0 : i64, tpu.core_type = #tpu.core_type<tc>, window_params = [{transform_indices = @transform_0, window_bounds = array<i64: 4, 16, 16>}, {transform_indices = @transform_1, window_bounds = array<i64: 4, 8, 8>}]} {
    %c0 = arith.constant 0 : index
    %c0_0 = arith.constant 0 : index
    %c0_1 = arith.constant 0 : index
    %0 = vector.load %arg2[%c0, %c0_0, %c0_1] : memref<4x16x16xf32, #tpu.memory_space<vmem>>, vector<4x16x16xf32>
    %1 = vector.shape_cast %0 : vector<4x16x16xf32> to vector<4x8x2x16xf32>
    %cst = arith.constant dense<0xFF800000> : vector<4x8x16xf32>
    %2 = vector.multi_reduction <maximumf>, %1, %cst [2] : vector<4x8x2x16xf32> to vector<4x8x16xf32>
    %3 = vector.shape_cast %2 : vector<4x8x16xf32> to vector<4x8x8x2xf32>
    %cst_2 = arith.constant dense<0xFF800000> : vector<4x8x8xf32>
    %4 = vector.multi_reduction <maximumf>, %3, %cst_2 [3] : vector<4x8x8x2xf32> to vector<4x8x8xf32>
    %c0_3 = arith.constant 0 : index
    %c0_4 = arith.constant 0 : index
    %c0_5 = arith.constant 0 : index
    %5 = vector.load %arg3[%c0_3, %c0_4, %c0_5] : memref<4x8x8xf32, #tpu.memory_space<vmem>>, vector<4x8x8xf32>
    tpu.vector_store %arg3[%c0_3, %c0_4, %c0_5], %4 {strides = array<i32>} : memref<4x8x8xf32, #tpu.memory_space<vmem>>, vector<4x8x8xf32>,
    return
  }
  func.func @transform_0(%arg0: i32, %arg1: i32) -> (i32, i32, i32) {
    %c0_i32 = arith.constant 0 : i32
    %c0_i32_0 = arith.constant 0 : i32
    return %arg0, %arg1, %c0_i32 : i32, i32, i32
  }
  func.func @transform_1(%arg0: i32, %arg1: i32) -> (i32, i32, i32) {
    %c0_i32 = arith.constant 0 : i32
    %c0_i32_0 = arith.constant 0 : i32
    return %arg0, %arg1, %c0_i32 : i32, i32, i32
  }
}

</mosaic_0001>

<bundles_post_ra>
// kernel: tpu_custom_call.1
= control target key start
LH: loop header
LB: loop body
LE: loop exit
PB: predicated region body
PF: predicated region fallthrough
CT: control target
= control target key end

     0   :  { %6 = vsyncpa [#allocation3], 0  ;;  %s4804_s0 = inlined_call_operand.hbm [shape: f32[8,16,16], index: 0, kind: input, shape index: {}]   ;;  %s4805_s1 = inlined_call_operand.hbm [shape: f32[8,8,8], index: 1, kind: output, shape index: {}]  }
   0x1   :  { %8 = vsyncpa [#allocation3 + $0x1], 0 }
   0x2   :  { %9 = vsyncpa [#allocation4], 0 }
   0x3   :  { %11 = vsyncpa [#allocation4 + $0x1], 0  ;;  %s2715_s6 = smov 0   ;;  %s2717_s7 = smov 0  }
   0x4   :  { %s2719_s8 = smov 0   ;;  %s2721_s9 = smov 0  }
   0x5   :  { %s2723_s10 = smov 0   ;;  %s2725_s11 = smov 0  }
   0x6 LB: > { %s2474_s12 = sadd.s32 4294967295, %s2688_s11   ;;  %s2475_s13 = sadd.s32 4294967294, %s2688_s11   ;;  %s2688_s11 = sphi %s2725_s11, %s17_s11   ;;  %s2684_s10 = sphi %s2723_s10, %s5160_s10   ;;  %s2680_s9 = sphi %s2721_s9, %s5159_s9   ;;  %s2676_s8 = sphi %s2719_s8, %s5158_s8   ;;  %s2672_s7 = sphi %s2717_s7, %s5157_s7   ;;  %s2668_s6 = sphi %s2715_s6, %s5156_s6  }
   0x7   : > { %s29_s14 = sadd.s32 1, %s2684_s10  ;;  %s38_s15 = sadd.s32 1, %s2676_s8 }
   0x8   : > { %p31_p0 = scmp.ge.s32.totalorder %s29_s14, 2  ;;  %p45_p1 = scmp.ne.s32.totalorder %s2676_s8, %s2672_s7 }
   0x9   : > { %p46_p2 = scmp.eq.s32.totalorder %s2688_s11, 0  ;;  %p51_p3 = scmp.ne.s32.totalorder %s2672_s7, %s2668_s6 }
   0xa   : > { %s5162_s14 = smov (%p31_p0, %s29_s14), 0  ;;  %p52_p5 = scmp.eq.s32.totalorder %s2474_s12, 0 }
   0xb   : > { %p2756_p4 = por %p46_p2, %p45_p1  ;;  %s33_s17 = ssub.s32 %s2684_s10, %s5162_s14 }
   0xc   : > { %p77_p6 = scmp.eq.s32.totalorder %s2474_s12, 1  ;;  %p36_p7 = scmp.eq.s32.totalorder %s33_s17, 0 }
   0xd   : > { %p2762_p8 = por %p52_p5, %p51_p3  ;;  %p83_p10 = scmp.eq.s32.totalorder %s2475_s13, 1 }
   0xe   : > { %p2766_p9 = por %p77_p6, %p45_p1  ;;  %p2505_p13 = scmp.lt.s32.totalorder %s2688_s11, 2 }
   0xf   : > { %s2771_s20 = scalar_select %p36_p7, %s2676_s8, %s38_s15  }
  0x10   : > { %s4829_s19 = scalar_select %p2766_p9, 1, 0 }
  0x11   : > { %p2773_p11 = por %p83_p10, %p51_p3  ;;  %s103_s22 = sand.u32 1, %s2676_s8  }
  0x12   : > { %s2478_s23 = sshll.u32 %s103_s22, 6  ;;  %s2491_s24 = sshll.u32 %s2684_s10, 10 }
  0x13   : > { %s4830_s21 = scalar_select %p2773_p11, 1, 0 }
  0x14   : > { %s2784_s27 = scalar_lea.hbm %s4804_s0, %s2491_s24  ;;  %s107_s28 = scalar_lea.vmem [#allocation2], %s2478_s23 }
  0x15   : > { %s117_s29 = sshll.u32 %s107_s28, 4  ;;  %p2790_p0 = pnand %p2505_p13, %p2756_p4  ;;  %s2786_s29 = int_to_ptr.vmem [resolvable:$true] %s117_s29 }
  0x16   : > { %s2795_s2 = scalar_lea.sflag [#allocation3], %s103_s22  ;;  %s2576_s3 = scalar_lea.hbm %s2784_s27, 1024 }
  0x17   : > { %p2577_p2 = scmp.ne.s32.totalorder %s2784_s27, %s2576_s3  ;;  %p2578_p3 = pneg %p2790_p0 }
  0x18   : > { %s2581_s12 = scalar_lea.hbm %s4804_s0, 2048  ;;  %p2582_p4 = scmp.lt.u32.totalorder %s2784_s27, %s4804_s0 }
  0x19   : > { %p2579_p5 = pnand %p2578_p3, %p2577_p2  ;;  %p2583_p7 = scmp.lt.u32.totalorder %s2581_s12, %s2576_s3 }
  0x1a   : > { %p2585_p13 = scmp.lt.u32.totalorder %s2576_s3, %s2784_s27 }
  0x1b   : > { %p2580_p6 = pneg %p2579_p5  ;;  %p2584_p10 = por %p2583_p7, %p2582_p4 }
  0x1d   : > { %p2586_p12 = por %p2585_p13, %p2584_p10 }
  0x1f   : > { %p2587_p1 = pnand %p2586_p12, %p2580_p6 }
  0x21   : > { %2590 = shalt.err (!%p2587_p1)
}
  0x22   : > { %s2591_s16 = scalar_lea.vmem %s2786_s29, 1024  ;;  %s2690_s17 = smov [#allocation2]  }
  0x23   : > { %p2592_p2 = scmp.ne.s32.totalorder %s2786_s29, %s2591_s16  ;;  %s2596_s22 = sshll.u32 %s2690_s17, 4  ;;  %s2597_s22 = int_to_ptr.vmem [resolvable:$false] %s2596_s22 }
  0x24   : > { %s2598_s23 = scalar_lea.vmem %s2597_s22, 2048  ;;  %p2599_p9 = scmp.lt.s32.totalorder %s2786_s29, %s2597_s22 }
  0x25   : > { %p2594_p5 = pnand %p2592_p2, %p2578_p3  ;;  %p2600_p4 = scmp.lt.s32.totalorder %s2598_s23, %s2591_s16 }
  0x27   : > { %p2595_p11 = pneg %p2594_p5  ;;  %p2601_p7 = por %p2600_p4, %p2599_p9 }
  0x29   : > { %p2602_p10 = pnand %p2601_p7, %p2595_p11 }
  0x2b   : > { %2605 = shalt.err (!%p2602_p10)
}
  0x2c   : > { %s2691_s24 = smov 128   ;;  %s2692_s25 = smov 8  }
  0x2d   : > { %2500 = dma.hbm_to_vmem [thread:$0]  (!%p2790_p0), %s2784_s27, 1024, %s2786_s29, %s2795_s2, %s2691_s24, %s2691_s24, %s2692_s25  }
  0x2e   : > { %p125_p12 = scmp.lt.s32.totalorder %s2688_s11, 3  ;;  %p4832_p1 = scmp.ge.s32.totalorder %s2688_s11, 1 }
  0x30   : > { %p126_p3 = pnand %p4832_p1, %p125_p12 }
  0x32   : > { %129 = sbr.rel (%p126_p3) target bundleno = 876 (0x36c), region = 24 }
  0x39   : > { %s2827_s26 = sand.u32 1, %s2672_s7  }
  0x3a   : > { %s2483_s28 = sshll.u32 %s2827_s26, 6  ;;  %s132_s3 = scalar_lea.sflag [#allocation3], %s2827_s26 }
  0x3b   : > { %s2831_s4 = scalar_lea.vmem [#allocation2], %s2483_s28 }
  0x3c   : > { %2659 = dma.done.wait (%p2762_p8), %s132_s3, 1024  }
  0x3d   : > { %2661 = vsyncadd (%p2762_p8), %s132_s3, 4294966272  ;;  %v4807_v0 = vlaneseq  ;;  %v2693_v1 = vmov 1983009808   ;;  %v157_v6 = vld [vmem:[%s2831_s4] sm:$0xff]  ;;  %vm341_vm0 = vcmask 123904   ;;  %v2845_v7 = vld [vmem:[%s2831_s4 + $0x8] sm:$0xff] }
  0x3e   : > { %v175_v2 = vunpack.c.l.s4 %v2693_v1  ;;  %v2848_v8 = vld [vmem:[%s2831_s4 + $0x10] sm:$0xff]  ;;  %v173_v10 = vcombine.high %v157_v6, %v157_v6  ;;  %v2858_v13 = vld [vmem:[%s2831_s4 + $0x18] sm:$0xff]  ;;  %v190_v15 = vcombine.high %v2845_v7, %v2845_v7  ;;  %s2694_s18 = smov 126   ;;  %s2695_s27 = smov 124   ;;  %vm1047_vm1 = vcmask 1041409  }
  0x3f   : > { %v2838_v3 = vshrl.u32 %v4807_v0, 7  ;;  %v207_v16 = vcombine.high %v2848_v8, %v2848_v8  ;;  %v224_v17 = vcombine.high %v2858_v13, %v2858_v13  ;;  %s2696_s29 = smov 122   ;;  %s2697_s30 = smov 120   ;;  %vm1050_vm2 = vcmask 1042434  }
  0x40   : > { %v176_v4 = vunpack.c.0.s8 %v175_v2  ;;  %s2698_s2 = smov 118   ;;  %s2699_s5 = smov 116   ;;  %vm1053_vm3 = vcmask 1043459   ;;  %vm1056_vm4 = vcmask 1044484   ;;  %vm1059_vm5 = vcmask 1045509  }
  0x41   : > { %4833 = vst [vmem:[#allocation8_spill] sm:$0xff] %v2838_v3  ;;  %s2700_s12 = smov 114   ;;  %vm1062_vm6 = vcmask 1046534   ;;  %vm1065_vm7 = vcmask 1047559   ;;  %vm2077_vm8 = vcmask 15360   ;;  %s2484_s13 = sshll.u32 %s2827_s26, 5 }
  0x42   : > { %v2841_v5 = vsub.s32 %v176_v4, %v2838_v3  ;;  %vm2368_vm9 = vcmask 64512   ;;  %s4704_s15 = scalar_lea.vmem [#allocation5], %s2484_s13  ;;  %s2492_s17 = sshll.u32 %s2680_s9, 9 }
  0x43   : > { %s2388_s16 = sshll.u32 %s4704_s15, 4  ;;  %s4751_s23 = scalar_lea.hbm %s4805_s1, %s2492_s17  ;;  %s4742_s16 = int_to_ptr.vmem [resolvable:$true] %s2388_s16 }
  0x44   : > { %4834 = vst [vmem:[#allocation9_spill] sm:$0xff] %v2841_v5  ;;  %v2851_v9 = vrot.slane %v157_v6, %v2841_v5  ;;  %v197_v11 = vrot.slane %v2845_v7, %v2841_v5  ;;  %v214_v12 = vrot.slane %v2848_v8, %v2841_v5  ;;  %v231_v14 = vrot.slane %v2858_v13, %v2841_v5  ;;  %s2374_s24 = scalar_lea.sflag [#allocation4], %s2827_s26  ;;  %s2606_s25 = scalar_lea.vmem %s4742_s16, 512 }
  0x45   : > { %v2871_v19 = vrot.slane %v173_v10, %v2841_v5  ;;  %p2607_p8 = scmp.ne.s32.totalorder %s4742_s16, %s2606_s25  ;;  %p5153_p9 = scmp.ne.s32.totalorder %s4829_s19, 0 }
  0x46   : > { %v342_v18 = vsel %vm341_vm0, %v2851_v9, -inf  ;;  %v370_v20 = vsel %vm341_vm0, %v197_v11, -inf  ;;  %v205_v21 = vcombine.high %v197_v11, %v197_v11  ;;  %v398_v24 = vsel %vm341_vm0, %v214_v12, -inf  ;;  %s2702_s28 = smov [#allocation5]  }
  0x47   : > { %v343_v22 = vrot.slane %v342_v18, 4  ;;  %v371_v23 = vrot.slane %v370_v20, 4  ;;  %v222_v25 = vcombine.high %v214_v12, %v214_v12  ;;  %v356_v26 = vsel %vm341_vm0, %v2871_v19, -inf  ;;  %p2608_p11 = pnand %p2607_p8, %p5153_p9  ;;  %s2610_s3 = sshll.u32 %s2702_s28, 4  ;;  %s2611_s3 = int_to_ptr.vmem [resolvable:$false] %s2610_s3 }
  0x48   : > { %v377_v27 = vsel %vm341_vm0, %v205_v21, -inf  ;;  %v399_v28 = vrot.slane %v398_v24, 4  ;;  %v426_v29 = vsel %vm341_vm0, %v231_v14, -inf  ;;  %v357_v31 = vrot.slane %v356_v26, 4  ;;  %p2613_p6 = scmp.lt.s32.totalorder %s4742_s16, %s2611_s3 }
  0x49   : > { %v344_v30 = vmax.f32 %v342_v18, %v343_v22  ;;  %v372_v32 = vmax.f32 %v370_v20, %v371_v23  ;;  %v378_v33 = vrot.slane %v377_v27, 4  ;;  %v405_v35 = vsel %vm341_vm0, %v222_v25, -inf  ;;  %p2609_p0 = pneg %p2608_p11 }
  0x4a   : > { %v400_v34 = vmax.f32 %v398_v24, %v399_v28  ;;  %v427_v36 = vrot.slane %v426_v29, 4  ;;  %v239_v37 = vcombine.high %v231_v14, %v231_v14  ;;  %v358_v39 = vmax.f32 %v356_v26, %v357_v31 }
  0x4b   : > { %v345_v38 = vrot.slane %v344_v30, 2  ;;  %v373_v40 = vrot.slane %v372_v32, 2  ;;  %v379_v41 = vmax.f32 %v377_v27, %v378_v33  ;;  %v406_v43 = vrot.slane %v405_v35, 4 }
  0x4c   : > { %v401_v42 = vrot.slane %v400_v34, 2  ;;  %v428_v44 = vmax.f32 %v426_v29, %v427_v36  ;;  %v433_v45 = vsel %vm341_vm0, %v239_v37, -inf  ;;  %v359_v47 = vrot.slane %v358_v39, 2 }
  0x4d   : > { %v346_v46 = vmax.f32 %v344_v30, %v345_v38  ;;  %v374_v48 = vmax.f32 %v372_v32, %v373_v40  ;;  %v380_v49 = vrot.slane %v379_v41, 2  ;;  %v407_v51 = vmax.f32 %v405_v35, %v406_v43 }
  0x4e   : > { %v402_v50 = vmax.f32 %v400_v34, %v401_v42  ;;  %v429_v52 = vrot.slane %v428_v44, 2  ;;  %v434_v53 = vrot.slane %v433_v45, 4  ;;  %v360_v55 = vmax.f32 %v358_v39, %v359_v47 }
  0x4f   : > { %v347_v54 = vrot.slane %v346_v46, 1  ;;  %v375_v56 = vrot.slane %v374_v48, 1  ;;  %v381_v57 = vmax.f32 %v379_v41, %v380_v49  ;;  %v408_v59 = vrot.slane %v407_v51, 2 }
  0x50   : > { %v403_v58 = vrot.slane %v402_v50, 1  ;;  %v430_v60 = vmax.f32 %v428_v44, %v429_v52  ;;  %v435_v61 = vmax.f32 %v433_v45, %v434_v53  ;;  %v361_v63 = vrot.slane %v360_v55, 1 }
  0x51   : > { %v2881_v62 = vmax.f32 %v346_v46, %v347_v54  ;;  %v2883_v1 = vmax.f32 %v374_v48, %v375_v56  ;;  %v382_v2 = vrot.slane %v381_v57, 1  ;;  %v409_v6 = vmax.f32 %v407_v51, %v408_v59 }
  0x52   : > { %v2885_v4 = vmax.f32 %v402_v50, %v403_v58  ;;  %v431_v10 = vrot.slane %v430_v60, 1  ;;  %v436_v11 = vrot.slane %v435_v61, 2  ;;  %v2889_v12 = vmax.f32 %v360_v55, %v361_v63 }
  0x53   : > { %598 = vrot.lane.b32.xlu0 %v2881_v62, %s2694_s18  ;;  %v2891_v14 = vmax.f32 %v381_v57, %v382_v2  ;;  %v188_v18 = vcombine.high %v2851_v9, %v2851_v9  ;;  %v189_v20 = vcombine.high %v2871_v19, %v2871_v19  ;;  %v410_v21 = vrot.slane %v409_v6, 1 }
  0x54   : > { %v2897_v22 = vmax.f32 %v430_v60, %v431_v10  ;;  %v437_v23 = vmax.f32 %v435_v61, %v436_v11  ;;  %v204_v24 = vrot.slane %v190_v15, %v2841_v5  ;;  %602 = vrot.lane.b32.xlu1 %v2889_v12, %s2694_s18  ;;  %v221_v9 = vrot.slane %v207_v16, %v2841_v5  ;;  %v161_v61 = vld [vmem:[%s2831_s4 + $0x20] sm:$0xff] }
  0x55   : > { %v349_v25 = vsel %vm341_vm0, %v188_v18, -inf  ;;  %v363_v26 = vsel %vm341_vm0, %v189_v20, -inf  ;;  %v238_v19 = vrot.slane %v224_v17, %v2841_v5  ;;  %v2915_v27 = vmax.f32 %v409_v6, %v410_v21 }
  0x56   : > { %v438_v7 = vrot.slane %v437_v23, 1  ;;  %v350_v15 = vrot.slane %v349_v25, 4  ;;  %v364_v28 = vrot.slane %v363_v26, 4  ;;  %v384_v29 = vsel %vm341_vm0, %v204_v24, -inf }
  0x57   : > { %606 = vrot.lane.b32.xlu0 %v2883_v1, %s2694_s18  ;;  %v206_v30 = vcombine.high %v204_v24, %v204_v24  ;;  %v412_v31 = vsel %vm341_vm0, %v221_v9, -inf  ;;  %v223_v8 = vcombine.high %v221_v9, %v221_v9  ;;  %v385_v13 = vrot.slane %v384_v29, 4 }
  0x58   : > { %v2921_v16 = vmax.f32 %v437_v23, %v438_v7  ;;  %v351_v32 = vmax.f32 %v349_v25, %v350_v15  ;;  %v365_v33 = vmax.f32 %v363_v26, %v364_v28  ;;  %608 = vrot.lane.b32.xlu1 %v2891_v14, %s2694_s18  ;;  %v413_v34 = vrot.slane %v412_v31, 4  ;;  %v162_v28 = vld [vmem:[%s2831_s4 + $0x28] sm:$0xff] }
  0x59   : > { %v391_v17 = vsel %vm341_vm0, %v206_v30, -inf  ;;  %v419_v35 = vsel %vm341_vm0, %v223_v8, -inf  ;;  %v440_v36 = vsel %vm341_vm0, %v238_v19, -inf  ;;  %v386_v39 = vmax.f32 %v384_v29, %v385_v13 }
  0x5a   : > { %v352_v37 = vrot.slane %v351_v32, 2  ;;  %v366_v38 = vrot.slane %v365_v33, 2  ;;  %v392_v40 = vrot.slane %v391_v17, 4  ;;  %v414_v41 = vmax.f32 %v412_v31, %v413_v34 }
  0x5b   : > { %614 = vrot.lane.b32.xlu0 %v2885_v4, %s2694_s18  ;;  %v420_v42 = vrot.slane %v419_v35, 4  ;;  %v441_v43 = vrot.slane %v440_v36, 4  ;;  %v240_v44 = vcombine.high %v238_v19, %v238_v19  ;;  %v387_v47 = vrot.slane %v386_v39, 2 }
  0x5c   : > { %v353_v45 = vmax.f32 %v351_v32, %v352_v37  ;;  %v367_v46 = vmax.f32 %v365_v33, %v366_v38  ;;  %v393_v48 = vmax.f32 %v391_v17, %v392_v40  ;;  %616 = vrot.lane.b32.xlu1 %v2915_v27, %s2694_s18  ;;  %v415_v49 = vrot.slane %v414_v41, 2 }
  0x5d   : > { %v421_v50 = vmax.f32 %v419_v35, %v420_v42  ;;  %v442_v51 = vmax.f32 %v440_v36, %v441_v43  ;;  %v447_v52 = vsel %vm341_vm0, %v240_v44, -inf  ;;  %v388_v55 = vmax.f32 %v386_v39, %v387_v47 }
  0x5e   : > { %v354_v53 = vrot.slane %v353_v45, 1  ;;  %v368_v54 = vrot.slane %v367_v46, 1  ;;  %v394_v56 = vrot.slane %v393_v48, 2  ;;  %v416_v57 = vmax.f32 %v414_v41, %v415_v49 }
  0x5f   : > { %622 = vrot.lane.b32.xlu0 %v2897_v22, %s2694_s18  ;;  %v422_v58 = vrot.slane %v421_v50, 2  ;;  %v443_v59 = vrot.slane %v442_v51, 2  ;;  %v448_v60 = vrot.slane %v447_v52, 4  ;;  %v389_v6 = vrot.slane %v388_v55, 1 }
  0x60   : > { %v2936_v63 = vmax.f32 %v353_v45, %v354_v53  ;;  %v2938_v2 = vmax.f32 %v367_v46, %v368_v54  ;;  %v395_v10 = vmax.f32 %v393_v48, %v394_v56  ;;  %624 = vrot.lane.b32.xlu1 %v2921_v16, %s2694_s18  ;;  %v417_v11 = vrot.slane %v416_v57, 1 }
  0x61   : > { %v423_v18 = vmax.f32 %v421_v50, %v422_v58  ;;  %v444_v20 = vmax.f32 %v442_v51, %v443_v59  ;;  %v449_v21 = vmax.f32 %v447_v52, %v448_v60  ;;  %v2942_v23 = vmax.f32 %v388_v55, %v389_v6 }
  0x62   : > { %v396_v24 = vrot.slane %v395_v10, 1  ;;  %v248_v25 = vrot.slane %v161_v61, %v2841_v5  ;;  %v241_v26 = vcombine.high %v161_v61, %v161_v61  ;;  %v2947_v9 = vmax.f32 %v416_v57, %v417_v11 }
  0x63   : > { %600 = vrot.lane.b32.xlu0 %v2936_v63, %s2694_s18  ;;  %v424_v19 = vrot.slane %v423_v18, 1  ;;  %v445_v7 = vrot.slane %v444_v20, 1  ;;  %v450_v15 = vrot.slane %v449_v21, 2  ;;  %v265_v37 = vrot.slane %v162_v28, %v2841_v5 }
  0x64   : > { %v2950_v29 = vmax.f32 %v395_v10, %v396_v24  ;;  %v454_v30 = vsel %vm341_vm0, %v248_v25, -inf  ;;  %v256_v31 = vcombine.high %v248_v25, %v248_v25  ;;  %v255_v8 = vrot.slane %v241_v26, %v2841_v5  ;;  %604 = vrot.lane.b32.xlu1 %v2938_v2, %s2694_s18  ;;  %v163_v26 = vld [vmem:[%s2831_s4 + $0x30] sm:$0xff] }
  0x65   : > { %v2956_v32 = vmax.f32 %v423_v18, %v424_v19  ;;  %v2958_v33 = vmax.f32 %v444_v20, %v445_v7  ;;  %v451_v13 = vmax.f32 %v449_v21, %v450_v15  ;;  %v455_v17 = vrot.slane %v454_v30, 4 }
  0x66   : > { %v461_v34 = vsel %vm341_vm0, %v256_v31, -inf  ;;  %v468_v35 = vsel %vm341_vm0, %v255_v8, -inf  ;;  %v257_v36 = vcombine.high %v255_v8, %v255_v8  ;;  %v482_v43 = vsel %vm341_vm0, %v265_v37, -inf }
  0x67   : > { %610 = vrot.lane.b32.xlu0 %v2942_v23, %s2694_s18  ;;  %v452_v38 = vrot.slane %v451_v13, 1  ;;  %v456_v39 = vmax.f32 %v454_v30, %v455_v17  ;;  %v462_v40 = vrot.slane %v461_v34, 4  ;;  %v469_v41 = vrot.slane %v468_v35, 4 }
  0x68   : > { %v475_v42 = vsel %vm341_vm0, %v257_v36, -inf  ;;  %v273_v44 = vcombine.high %v265_v37, %v265_v37  ;;  %v258_v45 = vcombine.high %v162_v28, %v162_v28  ;;  %612 = vrot.lane.b32.xlu1 %v2950_v29, %s2694_s18  ;;  %v483_v51 = vrot.slane %v482_v43, 4 }
  0x69   : > { %v2969_v46 = vmax.f32 %v451_v13, %v452_v38  ;;  %v457_v47 = vrot.slane %v456_v39, 2  ;;  %v463_v48 = vmax.f32 %v461_v34, %v462_v40  ;;  %v470_v49 = vmax.f32 %v468_v35, %v469_v41 }
  0x6a   : > { %v476_v50 = vrot.slane %v475_v42, 4  ;;  %v489_v52 = vsel %vm341_vm0, %v273_v44, -inf  ;;  %v272_v53 = vrot.slane %v258_v45, %v2841_v5  ;;  %v484_v59 = vmax.f32 %v482_v43, %v483_v51  ;;  %v164_v45 = vld [vmem:[%s2831_s4 + $0x38] sm:$0xff]  ;;  %s2612_s4 = scalar_lea.vmem %s2611_s3, 1024 }
  0x6b   : > { %618 = vrot.lane.b32.xlu0 %v2947_v9, %s2694_s18  ;;  %v458_v54 = vmax.f32 %v456_v39, %v457_v47  ;;  %v464_v55 = vrot.slane %v463_v48, 2  ;;  %v471_v56 = vrot.slane %v470_v49, 2  ;;  %v490_v57 = vrot.slane %v489_v52, 4  ;;  %p2614_p13 = scmp.lt.s32.totalorder %s2612_s4, %s2606_s25 }
  0x6c   : > { %v477_v58 = vmax.f32 %v475_v42, %v476_v50  ;;  %v496_v60 = vsel %vm341_vm0, %v272_v53, -inf  ;;  %v274_v61 = vcombine.high %v272_v53, %v272_v53  ;;  %620 = vrot.lane.b32.xlu1 %v2956_v32, %s2694_s18  ;;  %v485_v21 = vrot.slane %v484_v59, 2 }
  0x6d   : > { %v459_v6 = vrot.slane %v458_v54, 1  ;;  %v465_v10 = vmax.f32 %v463_v48, %v464_v55  ;;  %v472_v11 = vmax.f32 %v470_v49, %v471_v56  ;;  %v491_v18 = vmax.f32 %v489_v52, %v490_v57  ;;  %p2615_p2 = por %p2614_p13, %p2613_p6 }
  0x6e   : > { %v478_v20 = vrot.slane %v477_v58, 2  ;;  %v497_v24 = vrot.slane %v496_v60, 4  ;;  %v503_v25 = vsel %vm341_vm0, %v274_v61, -inf  ;;  %v486_v31 = vmax.f32 %v484_v59, %v485_v21 }
  0x6f   : > { %626 = vrot.lane.b32.xlu0 %v2958_v33, %s2694_s18  ;;  %v2982_v19 = vmax.f32 %v458_v54, %v459_v6  ;;  %v466_v7 = vrot.slane %v465_v10, 1  ;;  %v473_v15 = vrot.slane %v472_v11, 1  ;;  %v492_v28 = vrot.slane %v491_v18, 2  ;;  %p2616_p5 = pnand %p2615_p2, %p2609_p0 }
  0x70   : > { %v479_v30 = vmax.f32 %v477_v58, %v478_v20  ;;  %v498_v8 = vmax.f32 %v496_v60, %v497_v24  ;;  %v504_v13 = vrot.slane %v503_v25, 4  ;;  %628 = vrot.lane.b32.xlu1 %v2969_v46, %s2694_s18  ;;  %v282_v36 = vrot.slane %v163_v26, %v2841_v5 }
  0x71   : > { %v2986_v17 = vmax.f32 %v465_v10, %v466_v7  ;;  %v2988_v34 = vmax.f32 %v472_v11, %v473_v15  ;;  %v493_v35 = vmax.f32 %v491_v18, %v492_v28  ;;  %v487_v38 = vrot.slane %v486_v31, 1 }
  0x72   : > { %v480_v37 = vrot.slane %v479_v30, 1  ;;  %v499_v39 = vrot.slane %v498_v8, 2  ;;  %v505_v40 = vmax.f32 %v503_v25, %v504_v13  ;;  %v510_v42 = vsel %vm341_vm0, %v282_v36, -inf }
  0x73   : > { %630 = vrot.lane.b32.xlu0 %v2982_v19, %s2694_s18  ;;  %v494_v41 = vrot.slane %v493_v35, 1  ;;  %v290_v43 = vcombine.high %v282_v36, %v282_v36  ;;  %v275_v44 = vcombine.high %v163_v26, %v163_v26  ;;  %v2997_v48 = vmax.f32 %v486_v31, %v487_v38 }
  0x74   : > { %v2995_v47 = vmax.f32 %v479_v30, %v480_v37  ;;  %v500_v49 = vmax.f32 %v498_v8, %v499_v39  ;;  %v506_v50 = vrot.slane %v505_v40, 2  ;;  %632 = vrot.lane.b32.xlu1 %v2986_v17, %s2694_s18  ;;  %v511_v52 = vrot.slane %v510_v42, 4 }
  0x75   : > { %v3001_v51 = vmax.f32 %v493_v35, %v494_v41  ;;  %v517_v53 = vsel %vm341_vm0, %v290_v43, -inf  ;;  %v289_v54 = vrot.slane %v275_v44, %v2841_v5  ;;  %v299_v58 = vrot.slane %v164_v45, %v2841_v5 }
  0x76   : > { %v501_v55 = vrot.slane %v500_v49, 1  ;;  %v507_v56 = vmax.f32 %v505_v40, %v506_v50  ;;  %v518_v57 = vrot.slane %v517_v53, 4  ;;  %v512_v59 = vmax.f32 %v510_v42, %v511_v52 }
  0x77   : > { %634 = vrot.lane.b32.xlu0 %v2988_v34, %s2694_s18  ;;  %v524_v60 = vsel %vm341_vm0, %v289_v54, -inf  ;;  %v291_v61 = vcombine.high %v289_v54, %v289_v54  ;;  %v292_v6 = vcombine.high %v164_v45, %v164_v45  ;;  %v538_v25 = vsel %vm341_vm0, %v299_v58, -inf }
  0x78   : > { %v3009_v10 = vmax.f32 %v500_v49, %v501_v55  ;;  %v508_v11 = vrot.slane %v507_v56, 1  ;;  %v519_v18 = vmax.f32 %v517_v53, %v518_v57  ;;  %v525_v20 = vrot.slane %v524_v60, 4  ;;  %636 = vrot.lane.b32.xlu1 %v2995_v47, %s2694_s18 }
  0x79   : > { %v513_v21 = vrot.slane %v512_v59, 2  ;;  %v531_v24 = vsel %vm341_vm0, %v291_v61, -inf  ;;  %v307_v26 = vcombine.high %v299_v58, %v299_v58  ;;  %v539_v8 = vrot.slane %v538_v25, 4 }
  0x7a   : > { %v3015_v7 = vmax.f32 %v507_v56, %v508_v11  ;;  %v520_v15 = vrot.slane %v519_v18, 2  ;;  %v526_v28 = vmax.f32 %v524_v60, %v525_v20  ;;  %v532_v30 = vrot.slane %v531_v24, 4 }
  0x7b   : > { %638 = vrot.lane.b32.xlu0 %v2997_v48, %s2694_s18  ;;  %v514_v31 = vmax.f32 %v512_v59, %v513_v21  ;;  %v545_v13 = vsel %vm341_vm0, %v307_v26, -inf  ;;  %v306_v35 = vrot.slane %v292_v6, %v2841_v5  ;;  %v540_v41 = vmax.f32 %v538_v25, %v539_v8 }
  0x7c   : > { %v521_v36 = vmax.f32 %v519_v18, %v520_v15  ;;  %v527_v37 = vrot.slane %v526_v28, 2  ;;  %v533_v38 = vmax.f32 %v531_v24, %v532_v30  ;;  %v546_v39 = vrot.slane %v545_v13, 4  ;;  %640 = vrot.lane.b32.xlu1 %v3001_v51, %s2694_s18 }
  0x7d   : > { %v515_v40 = vrot.slane %v514_v31, 1  ;;  %v552_v42 = vsel %vm341_vm0, %v306_v35, -inf  ;;  %v308_v43 = vcombine.high %v306_v35, %v306_v35  ;;  %v541_v53 = vrot.slane %v540_v41, 2 }
  0x7e   : > { %v522_v44 = vrot.slane %v521_v36, 1  ;;  %v528_v45 = vmax.f32 %v526_v28, %v527_v37  ;;  %v534_v49 = vrot.slane %v533_v38, 2  ;;  %v547_v50 = vmax.f32 %v545_v13, %v546_v39 }
  0x7f   : > { %642 = vrot.lane.b32.xlu0 %v3009_v10, %s2694_s18  ;;  %v3026_v52 = vmax.f32 %v514_v31, %v515_v40  ;;  %v553_v54 = vrot.slane %v552_v42, 4  ;;  %v559_v55 = vsel %vm341_vm0, %v308_v43, -inf  ;;  %v542_v60 = vmax.f32 %v540_v41, %v541_v53 }
  0x80   : > { %v529_v56 = vrot.slane %v528_v45, 1  ;;  %v535_v57 = vmax.f32 %v533_v38, %v534_v49  ;;  %v548_v58 = vrot.slane %v547_v50, 2  ;;  %644 = vrot.lane.b32.xlu1 %v3015_v7, %s2694_s18  ;;  %v3031_v59 = vmax.f32 %v521_v36, %v522_v44 }
  0x81   : > { %v554_v61 = vmax.f32 %v552_v42, %v553_v54  ;;  %v560_v6 = vrot.slane %v559_v55, 4  ;;  %v543_v21 = vrot.slane %v542_v60, 1 }
  0x82   : > { %v536_v11 = vrot.slane %v535_v57, 1  ;;  %v549_v18 = vmax.f32 %v547_v50, %v548_v58  ;;  %v3035_v20 = vmax.f32 %v528_v45, %v529_v56 }
  0x83   : > { %646 = vrot.lane.b32.xlu0 %v3026_v52, %s2694_s18  ;;  %v555_v24 = vrot.slane %v554_v61, 2  ;;  %v561_v25 = vmax.f32 %v559_v55, %v560_v6  ;;  %v3043_v31 = vmax.f32 %v542_v60, %v543_v21 }
  0x84   : > { %648 = vrot.lane.b32.xlu1 %v3031_v59, %s2694_s18  ;;  %v3039_v26 = vmax.f32 %v535_v57, %v536_v11  ;;  %v550_v15 = vrot.slane %v549_v18, 1 }
  0x85   : > { %v556_v28 = vmax.f32 %v554_v61, %v555_v24  ;;  %v562_v30 = vrot.slane %v561_v25, 2 }
  0x86   : > { %v3047_v35 = vmax.f32 %v549_v18, %v550_v15 }
  0x87   : > { %650 = vrot.lane.b32.xlu0 %v3035_v20, %s2694_s18  ;;  %v557_v8 = vrot.slane %v556_v28, 1  ;;  %v563_v13 = vmax.f32 %v561_v25, %v562_v30 }
  0x88   : > { %652 = vrot.lane.b32.xlu1 %v3039_v26, %s2694_s18 }
  0x89   : > { %v564_v36 = vrot.slane %v563_v13, 1  ;;  %v3051_v37 = vmax.f32 %v556_v28, %v557_v8 }
  0x8b   : > { %654 = vrot.lane.b32.xlu0 %v3043_v31, %s2694_s18  ;;  %v3055_v38 = vmax.f32 %v563_v13, %v564_v36 }
  0x8c   : > { %656 = vrot.lane.b32.xlu1 %v3047_v35, %s2694_s18 }
  0x8f   : > { %658 = vrot.lane.b32.xlu0 %v3051_v37, %s2694_s18 }
  0x90   : > { %660 = vrot.lane.b32.xlu1 %v3055_v38, %s2694_s18 }
  0x93   : > { %662 = vrot.lane.b32.xlu0 %v2881_v62, %s2695_s27 }
  0x94   : > { %664 = vrot.lane.b32.xlu1 %v2936_v63, %s2695_s27 }
  0x97   : > { %666 = vrot.lane.b32.xlu0 %v2889_v12, %s2695_s27 }
  0x98   : > { %668 = vrot.lane.b32.xlu1 %v2938_v2, %s2695_s27 }
  0x9b   : > { %670 = vrot.lane.b32.xlu0 %v2883_v1, %s2695_s27 }
  0x9c   : > { %672 = vrot.lane.b32.xlu1 %v2891_v14, %s2695_s27 }
  0x9f   : > { %674 = vrot.lane.b32.xlu0 %v2942_v23, %s2695_s27 }
  0xa0   : > { %676 = vrot.lane.b32.xlu1 %v2950_v29, %s2695_s27 }
  0xa3   : > { %678 = vrot.lane.b32.xlu0 %v2885_v4, %s2695_s27 }
  0xa4   : > { %680 = vrot.lane.b32.xlu1 %v2915_v27, %s2695_s27 }
  0xa7   : > { %682 = vrot.lane.b32.xlu0 %v2947_v9, %s2695_s27 }
  0xa8   : > { %684 = vrot.lane.b32.xlu1 %v2956_v32, %s2695_s27 }
  0xab   : > { %686 = vrot.lane.b32.xlu0 %v2897_v22, %s2695_s27 }
  0xac   : > { %688 = vrot.lane.b32.xlu1 %v2921_v16, %s2695_s27 }
  0xaf   : > { %690 = vrot.lane.b32.xlu0 %v2958_v33, %s2695_s27 }
  0xb0   : > { %692 = vrot.lane.b32.xlu1 %v2969_v46, %s2695_s27 }
  0xb3   : > { %694 = vrot.lane.b32.xlu0 %v2982_v19, %s2695_s27 }
  0xb4   : > { %696 = vrot.lane.b32.xlu1 %v2986_v17, %s2695_s27 }
  0xb7   : > { %698 = vrot.lane.b32.xlu0 %v2988_v34, %s2695_s27 }
  0xb8   : > { %700 = vrot.lane.b32.xlu1 %v2995_v47, %s2695_s27 }
  0xbb   : > { %702 = vrot.lane.b32.xlu0 %v2997_v48, %s2695_s27 }
  0xbc   : > { %704 = vrot.lane.b32.xlu1 %v3001_v51, %s2695_s27 }
  0xbf   : > { %706 = vrot.lane.b32.xlu0 %v3009_v10, %s2695_s27 }
  0xc0   : > { %708 = vrot.lane.b32.xlu1 %v3015_v7, %s2695_s27 }
  0xc3   : > { %710 = vrot.lane.b32.xlu0 %v3026_v52, %s2695_s27 }
  0xc4   : > { %712 = vrot.lane.b32.xlu1 %v3031_v59, %s2695_s27 }
  0xc5   : > { %v3111_v39 = vpop.permute.xlu0 %598 }
  0xc6   : > { %v3117_v40 = vpop.permute.xlu1 %602 }
  0xc7   : > { %714 = vrot.lane.b32.xlu0 %v3035_v20, %s2695_s27 }
  0xc8   : > { %716 = vrot.lane.b32.xlu1 %v3039_v26, %s2695_s27 }
  0xc9   : > { %v3119_v41 = vpop.permute.xlu0 %606 }
  0xca   : > { %v3125_v42 = vpop.permute.xlu1 %608 }
  0xcb   : > { %718 = vrot.lane.b32.xlu0 %v3043_v31, %s2695_s27 }
  0xcc   : > { %720 = vrot.lane.b32.xlu1 %v3047_v35, %s2695_s27 }
  0xcd   : > { %v3127_v43 = vpop.permute.xlu0 %614 }
  0xce   : > { %v3133_v44 = vpop.permute.xlu1 %616 }
  0xcf   : > { %722 = vrot.lane.b32.xlu0 %v3051_v37, %s2695_s27 }
  0xd0   : > { %724 = vrot.lane.b32.xlu1 %v3055_v38, %s2695_s27 }
  0xd1   : > { %v3135_v45 = vpop.permute.xlu0 %622 }
  0xd2   : > { %v3141_v49 = vpop.permute.xlu1 %624 }
  0xd3   : > { %726 = vrot.lane.b32.xlu0 %v2881_v62, %s2696_s29 }
  0xd4   : > { %728 = vrot.lane.b32.xlu1 %v2936_v63, %s2696_s29 }
  0xd5   : > { %v3143_v50 = vpop.permute.xlu0 %600 }
  0xd6   : > { %v3149_v53 = vpop.permute.xlu1 %604 }
  0xd7   : > { %730 = vrot.lane.b32.xlu0 %v2889_v12, %s2696_s29 }
  0xd8   : > { %732 = vrot.lane.b32.xlu1 %v2938_v2, %s2696_s29 }
  0xd9   : > { %v3151_v54 = vpop.permute.xlu0 %610 }
  0xda   : > { %v3157_v55 = vpop.permute.xlu1 %612 }
  0xdb   : > { %734 = vrot.lane.b32.xlu0 %v2883_v1, %s2696_s29  ;;  %4835 = vst [vmem:[#allocation10_spill] sm:$0xff] %v3157_v55 }
  0xdc   : > { %736 = vrot.lane.b32.xlu1 %v2891_v14, %s2696_s29 }
  0xdd   : > { %v3159_v56 = vpop.permute.xlu0 %618 }
  0xde   : > { %v3165_v57 = vpop.permute.xlu1 %620 }
  0xdf   : > { %738 = vrot.lane.b32.xlu0 %v2942_v23, %s2696_s29 }
  0xe0   : > { %740 = vrot.lane.b32.xlu1 %v2950_v29, %s2696_s29 }
  0xe1   : > { %v3167_v58 = vpop.permute.xlu0 %626 }
  0xe2   : > { %4836 = vst [vmem:[#allocation11_spill] sm:$0xff] %v3167_v58  ;;  %v3173_v60 = vpop.permute.xlu1 %628 }
  0xe3   : > { %742 = vrot.lane.b32.xlu0 %v2885_v4, %s2696_s29  ;;  %4837 = vst [vmem:[#allocation12_spill] sm:$0xff] %v3173_v60 }
  0xe4   : > { %744 = vrot.lane.b32.xlu1 %v2915_v27, %s2696_s29 }
  0xe5   : > { %v3175_v61 = vpop.permute.xlu0 %630 }
  0xe6   : > { %v3181_v6 = vpop.permute.xlu1 %632 }
  0xe7   : > { %746 = vrot.lane.b32.xlu0 %v2947_v9, %s2696_s29 }
  0xe8   : > { %748 = vrot.lane.b32.xlu1 %v2956_v32, %s2696_s29 }
  0xe9   : > { %v3183_v11 = vpop.permute.xlu0 %634 }
  0xea   : > { %v3189_v18 = vpop.permute.xlu1 %636 }
  0xeb   : > { %750 = vrot.lane.b32.xlu0 %v2897_v22, %s2696_s29 }
  0xec   : > { %752 = vrot.lane.b32.xlu1 %v2921_v16, %s2696_s29 }
  0xed   : > { %v3191_v21 = vpop.permute.xlu0 %638 }
  0xee   : > { %4838 = vst [vmem:[#allocation13_spill] sm:$0xff] %v3191_v21  ;;  %v3197_v24 = vpop.permute.xlu1 %640 }
  0xef   : > { %754 = vrot.lane.b32.xlu0 %v2958_v33, %s2696_s29  ;;  %4839 = vst [vmem:[#allocation14_spill] sm:$0xff] %v3197_v24 }
  0xf0   : > { %756 = vrot.lane.b32.xlu1 %v2969_v46, %s2696_s29 }
  0xf1   : > { %v3199_v25 = vpop.permute.xlu0 %642 }
  0xf2   : > { %4840 = vst [vmem:[#allocation15_spill] sm:$0xff] %v3199_v25  ;;  %v3205_v15 = vpop.permute.xlu1 %644 }
  0xf3   : > { %758 = vrot.lane.b32.xlu0 %v2982_v19, %s2696_s29  ;;  %4841 = vst [vmem:[#allocation16_spill] sm:$0xff] %v3205_v15 }
  0xf4   : > { %760 = vrot.lane.b32.xlu1 %v2986_v17, %s2696_s29 }
  0xf5   : > { %v3207_v28 = vpop.permute.xlu0 %646 }
  0xf6   : > { %4842 = vst [vmem:[#allocation17_spill] sm:$0xff] %v3207_v28  ;;  %v3213_v30 = vpop.permute.xlu1 %648  ;;  %v1277_v28 = vrot.slane %v2986_v17, 7 }
  0xf7   : > { %762 = vrot.lane.b32.xlu0 %v2988_v34, %s2696_s29 }
  0xf8   : > { %764 = vrot.lane.b32.xlu1 %v2995_v47, %s2696_s29 }
  0xf9   : > { %v3215_v8 = vpop.permute.xlu0 %650 }
  0xfa   : > { %v3221_v13 = vpop.permute.xlu1 %652 }
  0xfb   : > { %766 = vrot.lane.b32.xlu0 %v2997_v48, %s2696_s29  ;;  %4843 = vst [vmem:[#allocation18_spill] sm:$0xff] %v3221_v13 }
  0xfc   : > { %768 = vrot.lane.b32.xlu1 %v3001_v51, %s2696_s29 }
  0xfd   : > { %v3223_v36 = vpop.permute.xlu0 %654 }
  0xfe   : > { %4844 = vst [vmem:[#allocation19_spill] sm:$0xff] %v3223_v36  ;;  %v3229_v0 = vpop.permute.xlu1 %656 }
  0xff   : > { %770 = vrot.lane.b32.xlu0 %v3009_v10, %s2696_s29  ;;  %4845 = vst [vmem:[#allocation20_spill] sm:$0xff] %v3229_v0 }
 0x100   : > { %772 = vrot.lane.b32.xlu1 %v3015_v7, %s2696_s29 }
 0x101   : > { %v3231_v5 = vpop.permute.xlu0 %658 }
 0x102   : > { %4846 = vst [vmem:[#allocation21_spill] sm:$0xff] %v3231_v5  ;;  %v3237_v3 = vpop.permute.xlu1 %660 }
 0x103   : > { %774 = vrot.lane.b32.xlu0 %v3026_v52, %s2696_s29  ;;  %4847 = vst [vmem:[#allocation22_spill] sm:$0xff] %v3237_v3 }
 0x104   : > { %776 = vrot.lane.b32.xlu1 %v3031_v59, %s2696_s29 }
 0x105   : > { %v3239_v15 = vpop.permute.xlu0 %662 }
 0x106   : > { %4848 = vst [vmem:[#allocation23_spill] sm:$0xff] %v3239_v15  ;;  %v3245_v25 = vpop.permute.xlu1 %664 }
 0x107   : > { %778 = vrot.lane.b32.xlu0 %v3035_v20, %s2696_s29  ;;  %4849 = vst [vmem:[#allocation24_spill] sm:$0xff] %v3245_v25 }
 0x108   : > { %780 = vrot.lane.b32.xlu1 %v3039_v26, %s2696_s29 }
 0x109   : > { %v3247_v0 = vpop.permute.xlu0 %666 }
 0x10a   : > { %4850 = vst [vmem:[#allocation25_spill] sm:$0xff] %v3247_v0  ;;  %v3253_v5 = vpop.permute.xlu1 %668 }
 0x10b   : > { %782 = vrot.lane.b32.xlu0 %v3043_v31, %s2696_s29  ;;  %4851 = vst [vmem:[#allocation26_spill] sm:$0xff] %v3253_v5 }
 0x10c   : > { %784 = vrot.lane.b32.xlu1 %v3047_v35, %s2696_s29 }
 0x10d   : > { %v3255_v3 = vpop.permute.xlu0 %670 }
 0x10e   : > { %4852 = vst [vmem:[#allocation27_spill] sm:$0xff] %v3255_v3  ;;  %v3261_v24 = vpop.permute.xlu1 %672 }
 0x10f   : > { %786 = vrot.lane.b32.xlu0 %v3051_v37, %s2696_s29  ;;  %4853 = vst [vmem:[#allocation28_spill] sm:$0xff] %v3261_v24 }
 0x110   : > { %788 = vrot.lane.b32.xlu1 %v3055_v38, %s2696_s29 }
 0x111   : > { %v3263_v60 = vpop.permute.xlu0 %674 }
 0x112   : > { %4854 = vst [vmem:[#allocation29_spill] sm:$0xff] %v3263_v60  ;;  %v3269_v5 = vpop.permute.xlu1 %676 }
 0x113   : > { %790 = vrot.lane.b32.xlu0 %v2881_v62, %s2697_s30  ;;  %4855 = vst [vmem:[#allocation30_spill] sm:$0xff] %v3269_v5 }
 0x114   : > { %792 = vrot.lane.b32.xlu1 %v2936_v63, %s2697_s30 }
 0x115   : > { %v3271_v3 = vpop.permute.xlu0 %678 }
 0x116   : > { %4856 = vst [vmem:[#allocation31_spill] sm:$0xff] %v3271_v3  ;;  %v3277_v24 = vpop.permute.xlu1 %680 }
 0x117   : > { %794 = vrot.lane.b32.xlu0 %v2889_v12, %s2697_s30  ;;  %4857 = vst [vmem:[#allocation32_spill] sm:$0xff] %v3277_v24 }
 0x118   : > { %796 = vrot.lane.b32.xlu1 %v2938_v2, %s2697_s30 }
 0x119   : > { %v3279_v60 = vpop.permute.xlu0 %682 }
 0x11a   : > { %4858 = vst [vmem:[#allocation33_spill] sm:$0xff] %v3279_v60  ;;  %v3285_v15 = vpop.permute.xlu1 %684 }
 0x11b   : > { %798 = vrot.lane.b32.xlu0 %v2883_v1, %s2697_s30  ;;  %4859 = vst [vmem:[#allocation34_spill] sm:$0xff] %v3285_v15 }
 0x11c   : > { %800 = vrot.lane.b32.xlu1 %v2891_v14, %s2697_s30 }
 0x11d   : > { %v3287_v5 = vpop.permute.xlu0 %686 }
 0x11e   : > { %4860 = vst [vmem:[#allocation35_spill] sm:$0xff] %v3287_v5  ;;  %v3293_v3 = vpop.permute.xlu1 %688 }
 0x11f   : > { %802 = vrot.lane.b32.xlu0 %v2942_v23, %s2697_s30  ;;  %4861 = vst [vmem:[#allocation36_spill] sm:$0xff] %v3293_v3 }
 0x120   : > { %804 = vrot.lane.b32.xlu1 %v2950_v29, %s2697_s30 }
 0x121   : > { %v3295_v24 = vpop.permute.xlu0 %690 }
 0x122   : > { %4862 = vst [vmem:[#allocation37_spill] sm:$0xff] %v3295_v24  ;;  %v3301_v60 = vpop.permute.xlu1 %692 }
 0x123   : > { %806 = vrot.lane.b32.xlu0 %v2885_v4, %s2697_s30  ;;  %4863 = vst [vmem:[#allocation38_spill] sm:$0xff] %v3301_v60 }
 0x124   : > { %808 = vrot.lane.b32.xlu1 %v2915_v27, %s2697_s30 }
 0x125   : > { %v3303_v15 = vpop.permute.xlu0 %694 }
 0x126   : > { %4864 = vst [vmem:[#allocation39_spill] sm:$0xff] %v3303_v15  ;;  %v3309_v5 = vpop.permute.xlu1 %696 }
 0x127   : > { %810 = vrot.lane.b32.xlu0 %v2947_v9, %s2697_s30  ;;  %4865 = vst [vmem:[#allocation40_spill] sm:$0xff] %v3309_v5 }
 0x128   : > { %812 = vrot.lane.b32.xlu1 %v2956_v32, %s2697_s30 }
 0x129   : > { %v3311_v3 = vpop.permute.xlu0 %698 }
 0x12a   : > { %4866 = vst [vmem:[#allocation41_spill] sm:$0xff] %v3311_v3  ;;  %v3317_v24 = vpop.permute.xlu1 %700 }
 0x12b   : > { %814 = vrot.lane.b32.xlu0 %v2897_v22, %s2697_s30  ;;  %4867 = vst [vmem:[#allocation42_spill] sm:$0xff] %v3317_v24 }
 0x12c   : > { %816 = vrot.lane.b32.xlu1 %v2921_v16, %s2697_s30 }
 0x12d   : > { %v3319_v60 = vpop.permute.xlu0 %702 }
 0x12e   : > { %4868 = vst [vmem:[#allocation43_spill] sm:$0xff] %v3319_v60  ;;  %v3325_v15 = vpop.permute.xlu1 %704 }
 0x12f   : > { %818 = vrot.lane.b32.xlu0 %v2958_v33, %s2697_s30  ;;  %4869 = vst [vmem:[#allocation44_spill] sm:$0xff] %v3325_v15 }
 0x130   : > { %820 = vrot.lane.b32.xlu1 %v2969_v46, %s2697_s30 }
 0x131   : > { %v3327_v5 = vpop.permute.xlu0 %706 }
 0x132   : > { %4870 = vst [vmem:[#allocation45_spill] sm:$0xff] %v3327_v5  ;;  %v3333_v3 = vpop.permute.xlu1 %708 }
 0x133   : > { %822 = vrot.lane.b32.xlu0 %v2982_v19, %s2697_s30  ;;  %4871 = vst [vmem:[#allocation46_spill] sm:$0xff] %v3333_v3 }
 0x134   : > { %824 = vrot.lane.b32.xlu1 %v2986_v17, %s2697_s30 }
 0x135   : > { %v3335_v24 = vpop.permute.xlu0 %710 }
 0x136   : > { %4872 = vst [vmem:[#allocation47_spill] sm:$0xff] %v3335_v24  ;;  %v3341_v60 = vpop.permute.xlu1 %712 }
 0x137   : > { %826 = vrot.lane.b32.xlu0 %v2988_v34, %s2697_s30  ;;  %4873 = vst [vmem:[#allocation48_spill] sm:$0xff] %v3341_v60 }
 0x138   : > { %828 = vrot.lane.b32.xlu1 %v2995_v47, %s2697_s30 }
 0x139   : > { %v3343_v15 = vpop.permute.xlu0 %714 }
 0x13a   : > { %4874 = vst [vmem:[#allocation49_spill] sm:$0xff] %v3343_v15  ;;  %v3349_v5 = vpop.permute.xlu1 %716 }
 0x13b   : > { %830 = vrot.lane.b32.xlu0 %v2997_v48, %s2697_s30  ;;  %4875 = vst [vmem:[#allocation50_spill] sm:$0xff] %v3349_v5 }
 0x13c   : > { %832 = vrot.lane.b32.xlu1 %v3001_v51, %s2697_s30 }
 0x13d   : > { %v3351_v3 = vpop.permute.xlu0 %718 }
 0x13e   : > { %4876 = vst [vmem:[#allocation51_spill] sm:$0xff] %v3351_v3  ;;  %v3357_v24 = vpop.permute.xlu1 %720 }
 0x13f   : > { %834 = vrot.lane.b32.xlu0 %v3009_v10, %s2697_s30  ;;  %4877 = vst [vmem:[#allocation52_spill] sm:$0xff] %v3357_v24 }
 0x140   : > { %836 = vrot.lane.b32.xlu1 %v3015_v7, %s2697_s30 }
 0x141   : > { %v3359_v60 = vpop.permute.xlu0 %722 }
 0x142   : > { %4878 = vst [vmem:[#allocation53_spill] sm:$0xff] %v3359_v60  ;;  %v3365_v15 = vpop.permute.xlu1 %724 }
 0x143   : > { %838 = vrot.lane.b32.xlu0 %v3026_v52, %s2697_s30  ;;  %4879 = vst [vmem:[#allocation54_spill] sm:$0xff] %v3365_v15 }
 0x144   : > { %840 = vrot.lane.b32.xlu1 %v3031_v59, %s2697_s30 }
 0x145   : > { %v3367_v5 = vpop.permute.xlu0 %726 }
 0x146   : > { %4880 = vst [vmem:[#allocation55_spill] sm:$0xff] %v3367_v5  ;;  %v3373_v3 = vpop.permute.xlu1 %728 }
 0x147   : > { %842 = vrot.lane.b32.xlu0 %v3035_v20, %s2697_s30  ;;  %4881 = vst [vmem:[#allocation56_spill] sm:$0xff] %v3373_v3 }
 0x148   : > { %844 = vrot.lane.b32.xlu1 %v3039_v26, %s2697_s30 }
 0x149   : > { %v3375_v24 = vpop.permute.xlu0 %730 }
 0x14a   : > { %4882 = vst [vmem:[#allocation57_spill] sm:$0xff] %v3375_v24  ;;  %v3381_v60 = vpop.permute.xlu1 %732 }
 0x14b   : > { %846 = vrot.lane.b32.xlu0 %v3043_v31, %s2697_s30  ;;  %4883 = vst [vmem:[#allocation58_spill] sm:$0xff] %v3381_v60 }
 0x14c   : > { %848 = vrot.lane.b32.xlu1 %v3047_v35, %s2697_s30 }
 0x14d   : > { %v3383_v15 = vpop.permute.xlu0 %734 }
 0x14e   : > { %4884 = vst [vmem:[#allocation59_spill] sm:$0xff] %v3383_v15  ;;  %v3389_v5 = vpop.permute.xlu1 %736 }
 0x14f   : > { %850 = vrot.lane.b32.xlu0 %v3051_v37, %s2697_s30  ;;  %4885 = vst [vmem:[#allocation60_spill] sm:$0xff] %v3389_v5 }
 0x150   : > { %852 = vrot.lane.b32.xlu1 %v3055_v38, %s2697_s30 }
 0x151   : > { %v3391_v3 = vpop.permute.xlu0 %738 }
 0x152   : > { %4886 = vst [vmem:[#allocation61_spill] sm:$0xff] %v3391_v3  ;;  %v3397_v60 = vpop.permute.xlu1 %740 }
 0x153   : > { %854 = vrot.lane.b32.xlu0 %v2881_v62, %s2698_s2  ;;  %4887 = vst [vmem:[#allocation62_spill] sm:$0xff] %v3397_v60 }
 0x154   : > { %856 = vrot.lane.b32.xlu1 %v2936_v63, %s2698_s2 }
 0x155   : > { %v3399_v15 = vpop.permute.xlu0 %742 }
 0x156   : > { %4888 = vst [vmem:[#allocation63_spill] sm:$0xff] %v3399_v15  ;;  %v3405_v5 = vpop.permute.xlu1 %744 }
 0x157   : > { %858 = vrot.lane.b32.xlu0 %v2889_v12, %s2698_s2  ;;  %4889 = vst [vmem:[#allocation64_spill] sm:$0xff] %v3405_v5 }
 0x158   : > { %860 = vrot.lane.b32.xlu1 %v2938_v2, %s2698_s2 }
 0x159   : > { %v3407_v3 = vpop.permute.xlu0 %746 }
 0x15a   : > { %4890 = vst [vmem:[#allocation65_spill] sm:$0xff] %v3407_v3  ;;  %v3413_v24 = vpop.permute.xlu1 %748 }
 0x15b   : > { %862 = vrot.lane.b32.xlu0 %v2883_v1, %s2698_s2  ;;  %4891 = vst [vmem:[#allocation66_spill] sm:$0xff] %v3413_v24 }
 0x15c   : > { %864 = vrot.lane.b32.xlu1 %v2891_v14, %s2698_s2 }
 0x15d   : > { %v3415_v60 = vpop.permute.xlu0 %750 }
 0x15e   : > { %4892 = vst [vmem:[#allocation67_spill] sm:$0xff] %v3415_v60  ;;  %v3421_v15 = vpop.permute.xlu1 %752 }
 0x15f   : > { %866 = vrot.lane.b32.xlu0 %v2942_v23, %s2698_s2  ;;  %4893 = vst [vmem:[#allocation68_spill] sm:$0xff] %v3421_v15 }
 0x160   : > { %868 = vrot.lane.b32.xlu1 %v2950_v29, %s2698_s2 }
 0x161   : > { %v3423_v5 = vpop.permute.xlu0 %754 }
 0x162   : > { %4894 = vst [vmem:[#allocation69_spill] sm:$0xff] %v3423_v5  ;;  %v3429_v3 = vpop.permute.xlu1 %756 }
 0x163   : > { %870 = vrot.lane.b32.xlu0 %v2885_v4, %s2698_s2  ;;  %4895 = vst [vmem:[#allocation70_spill] sm:$0xff] %v3429_v3 }
 0x164   : > { %872 = vrot.lane.b32.xlu1 %v2915_v27, %s2698_s2 }
 0x165   : > { %v3431_v24 = vpop.permute.xlu0 %758 }
 0x166   : > { %4896 = vst [vmem:[#allocation71_spill] sm:$0xff] %v3431_v24  ;;  %v3437_v60 = vpop.permute.xlu1 %760 }
 0x167   : > { %874 = vrot.lane.b32.xlu0 %v2947_v9, %s2698_s2  ;;  %4897 = vst [vmem:[#allocation72_spill] sm:$0xff] %v3437_v60 }
 0x168   : > { %876 = vrot.lane.b32.xlu1 %v2956_v32, %s2698_s2 }
 0x169   : > { %v3439_v15 = vpop.permute.xlu0 %762 }
 0x16a   : > { %4898 = vst [vmem:[#allocation73_spill] sm:$0xff] %v3439_v15  ;;  %v3445_v5 = vpop.permute.xlu1 %764 }
 0x16b   : > { %878 = vrot.lane.b32.xlu0 %v2897_v22, %s2698_s2  ;;  %4899 = vst [vmem:[#allocation74_spill] sm:$0xff] %v3445_v5 }
 0x16c   : > { %880 = vrot.lane.b32.xlu1 %v2921_v16, %s2698_s2 }
 0x16d   : > { %v3447_v3 = vpop.permute.xlu0 %766 }
 0x16e   : > { %4900 = vst [vmem:[#allocation75_spill] sm:$0xff] %v3447_v3  ;;  %v3453_v24 = vpop.permute.xlu1 %768 }
 0x16f   : > { %882 = vrot.lane.b32.xlu0 %v2958_v33, %s2698_s2  ;;  %4901 = vst [vmem:[#allocation76_spill] sm:$0xff] %v3453_v24 }
 0x170   : > { %884 = vrot.lane.b32.xlu1 %v2969_v46, %s2698_s2 }
 0x171   : > { %v3455_v60 = vpop.permute.xlu0 %770 }
 0x172   : > { %4902 = vst [vmem:[#allocation77_spill] sm:$0xff] %v3455_v60  ;;  %v3461_v15 = vpop.permute.xlu1 %772 }
 0x173   : > { %886 = vrot.lane.b32.xlu0 %v2982_v19, %s2698_s2  ;;  %4903 = vst [vmem:[#allocation78_spill] sm:$0xff] %v3461_v15 }
 0x174   : > { %888 = vrot.lane.b32.xlu1 %v2986_v17, %s2698_s2 }
 0x175   : > { %v3463_v5 = vpop.permute.xlu0 %774 }
 0x176   : > { %4904 = vst [vmem:[#allocation79_spill] sm:$0xff] %v3463_v5  ;;  %v3469_v3 = vpop.permute.xlu1 %776 }
 0x177   : > { %890 = vrot.lane.b32.xlu0 %v2988_v34, %s2698_s2  ;;  %4905 = vst [vmem:[#allocation80_spill] sm:$0xff] %v3469_v3 }
 0x178   : > { %892 = vrot.lane.b32.xlu1 %v2995_v47, %s2698_s2 }
 0x179   : > { %v3471_v24 = vpop.permute.xlu0 %778 }
 0x17a   : > { %4906 = vst [vmem:[#allocation81_spill] sm:$0xff] %v3471_v24  ;;  %v3477_v60 = vpop.permute.xlu1 %780 }
 0x17b   : > { %894 = vrot.lane.b32.xlu0 %v2997_v48, %s2698_s2  ;;  %4907 = vst [vmem:[#allocation82_spill] sm:$0xff] %v3477_v60 }
 0x17c   : > { %896 = vrot.lane.b32.xlu1 %v3001_v51, %s2698_s2 }
 0x17d   : > { %v3479_v15 = vpop.permute.xlu0 %782 }
 0x17e   : > { %4908 = vst [vmem:[#allocation83_spill] sm:$0xff] %v3479_v15  ;;  %v3485_v5 = vpop.permute.xlu1 %784 }
 0x17f   : > { %898 = vrot.lane.b32.xlu0 %v3009_v10, %s2698_s2  ;;  %4909 = vst [vmem:[#allocation84_spill] sm:$0xff] %v3485_v5 }
 0x180   : > { %900 = vrot.lane.b32.xlu1 %v3015_v7, %s2698_s2 }
 0x181   : > { %v3487_v3 = vpop.permute.xlu0 %786 }
 0x182   : > { %4910 = vst [vmem:[#allocation85_spill] sm:$0xff] %v3487_v3  ;;  %v3493_v24 = vpop.permute.xlu1 %788 }
 0x183   : > { %902 = vrot.lane.b32.xlu0 %v3026_v52, %s2698_s2  ;;  %4911 = vst [vmem:[#allocation86_spill] sm:$0xff] %v3493_v24 }
 0x184   : > { %904 = vrot.lane.b32.xlu1 %v3031_v59, %s2698_s2 }
 0x185   : > { %v3495_v60 = vpop.permute.xlu0 %790 }
 0x186   : > { %4912 = vst [vmem:[#allocation87_spill] sm:$0xff] %v3495_v60  ;;  %v3501_v15 = vpop.permute.xlu1 %792 }
 0x187   : > { %906 = vrot.lane.b32.xlu0 %v3035_v20, %s2698_s2  ;;  %4913 = vst [vmem:[#allocation88_spill] sm:$0xff] %v3501_v15 }
 0x188   : > { %908 = vrot.lane.b32.xlu1 %v3039_v26, %s2698_s2 }
 0x189   : > { %v3503_v5 = vpop.permute.xlu0 %794 }
 0x18a   : > { %4914 = vst [vmem:[#allocation89_spill] sm:$0xff] %v3503_v5  ;;  %v3509_v3 = vpop.permute.xlu1 %796 }
 0x18b   : > { %910 = vrot.lane.b32.xlu0 %v3043_v31, %s2698_s2  ;;  %4915 = vst [vmem:[#allocation90_spill] sm:$0xff] %v3509_v3 }
 0x18c   : > { %912 = vrot.lane.b32.xlu1 %v3047_v35, %s2698_s2 }
 0x18d   : > { %v3511_v24 = vpop.permute.xlu0 %798 }
 0x18e   : > { %4916 = vst [vmem:[#allocation91_spill] sm:$0xff] %v3511_v24  ;;  %v3517_v60 = vpop.permute.xlu1 %800 }
 0x18f   : > { %914 = vrot.lane.b32.xlu0 %v3051_v37, %s2698_s2  ;;  %4917 = vst [vmem:[#allocation92_spill] sm:$0xff] %v3517_v60 }
 0x190   : > { %916 = vrot.lane.b32.xlu1 %v3055_v38, %s2698_s2 }
 0x191   : > { %v3519_v15 = vpop.permute.xlu0 %802 }
 0x192   : > { %4918 = vst [vmem:[#allocation93_spill] sm:$0xff] %v3519_v15  ;;  %v3525_v3 = vpop.permute.xlu1 %804 }
 0x193   : > { %918 = vrot.lane.b32.xlu0 %v2881_v62, %s2699_s5  ;;  %4919 = vst [vmem:[#allocation94_spill] sm:$0xff] %v3525_v3 }
 0x194   : > { %920 = vrot.lane.b32.xlu1 %v2936_v63, %s2699_s5 }
 0x195   : > { %v3527_v24 = vpop.permute.xlu0 %806 }
 0x196   : > { %4920 = vst [vmem:[#allocation95_spill] sm:$0xff] %v3527_v24  ;;  %v3533_v60 = vpop.permute.xlu1 %808 }
 0x197   : > { %922 = vrot.lane.b32.xlu0 %v2889_v12, %s2699_s5  ;;  %4921 = vst [vmem:[#allocation96_spill] sm:$0xff] %v3533_v60 }
 0x198   : > { %924 = vrot.lane.b32.xlu1 %v2938_v2, %s2699_s5 }
 0x199   : > { %v3535_v15 = vpop.permute.xlu0 %810 }
 0x19a   : > { %4922 = vst [vmem:[#allocation97_spill] sm:$0xff] %v3535_v15  ;;  %v3541_v5 = vpop.permute.xlu1 %812 }
 0x19b   : > { %926 = vrot.lane.b32.xlu0 %v2883_v1, %s2699_s5  ;;  %4923 = vst [vmem:[#allocation98_spill] sm:$0xff] %v3541_v5 }
 0x19c   : > { %928 = vrot.lane.b32.xlu1 %v2891_v14, %s2699_s5 }
 0x19d   : > { %v3543_v3 = vpop.permute.xlu0 %814 }
 0x19e   : > { %4924 = vst [vmem:[#allocation99_spill] sm:$0xff] %v3543_v3  ;;  %v3549_v24 = vpop.permute.xlu1 %816 }
 0x19f   : > { %930 = vrot.lane.b32.xlu0 %v2942_v23, %s2699_s5  ;;  %4925 = vst [vmem:[#allocation100_spill] sm:$0xff] %v3549_v24 }
 0x1a0   : > { %932 = vrot.lane.b32.xlu1 %v2950_v29, %s2699_s5 }
 0x1a1   : > { %v3551_v60 = vpop.permute.xlu0 %818 }
 0x1a2   : > { %4926 = vst [vmem:[#allocation101_spill] sm:$0xff] %v3551_v60  ;;  %v3557_v15 = vpop.permute.xlu1 %820 }
 0x1a3   : > { %934 = vrot.lane.b32.xlu0 %v2885_v4, %s2699_s5  ;;  %4927 = vst [vmem:[#allocation102_spill] sm:$0xff] %v3557_v15 }
 0x1a4   : > { %936 = vrot.lane.b32.xlu1 %v2915_v27, %s2699_s5 }
 0x1a5   : > { %v3559_v5 = vpop.permute.xlu0 %822 }
 0x1a6   : > { %4928 = vst [vmem:[#allocation103_spill] sm:$0xff] %v3559_v5  ;;  %v3565_v3 = vpop.permute.xlu1 %824 }
 0x1a7   : > { %938 = vrot.lane.b32.xlu0 %v2947_v9, %s2699_s5  ;;  %4929 = vst [vmem:[#allocation104_spill] sm:$0xff] %v3565_v3 }
 0x1a8   : > { %940 = vrot.lane.b32.xlu1 %v2956_v32, %s2699_s5 }
 0x1a9   : > { %v3567_v24 = vpop.permute.xlu0 %826 }
 0x1aa   : > { %4930 = vst [vmem:[#allocation105_spill] sm:$0xff] %v3567_v24  ;;  %v3573_v60 = vpop.permute.xlu1 %828 }
 0x1ab   : > { %942 = vrot.lane.b32.xlu0 %v2897_v22, %s2699_s5  ;;  %4931 = vst [vmem:[#allocation106_spill] sm:$0xff] %v3573_v60 }
 0x1ac   : > { %944 = vrot.lane.b32.xlu1 %v2921_v16, %s2699_s5 }
 0x1ad   : > { %v3575_v15 = vpop.permute.xlu0 %830 }
 0x1ae   : > { %4932 = vst [vmem:[#allocation107_spill] sm:$0xff] %v3575_v15  ;;  %v3581_v5 = vpop.permute.xlu1 %832 }
 0x1af   : > { %946 = vrot.lane.b32.xlu0 %v2958_v33, %s2699_s5  ;;  %4933 = vst [vmem:[#allocation108_spill] sm:$0xff] %v3581_v5 }
 0x1b0   : > { %948 = vrot.lane.b32.xlu1 %v2969_v46, %s2699_s5 }
 0x1b1   : > { %v3583_v3 = vpop.permute.xlu0 %834 }
 0x1b2   : > { %4934 = vst [vmem:[#allocation109_spill] sm:$0xff] %v3583_v3  ;;  %v3589_v24 = vpop.permute.xlu1 %836 }
 0x1b3   : > { %950 = vrot.lane.b32.xlu0 %v2982_v19, %s2699_s5  ;;  %4935 = vst [vmem:[#allocation110_spill] sm:$0xff] %v3589_v24 }
 0x1b4   : > { %952 = vrot.lane.b32.xlu1 %v2986_v17, %s2699_s5 }
 0x1b5   : > { %v3591_v60 = vpop.permute.xlu0 %838 }
 0x1b6   : > { %4936 = vst [vmem:[#allocation111_spill] sm:$0xff] %v3591_v60  ;;  %v3597_v15 = vpop.permute.xlu1 %840 }
 0x1b7   : > { %954 = vrot.lane.b32.xlu0 %v2988_v34, %s2699_s5  ;;  %4937 = vst [vmem:[#allocation112_spill] sm:$0xff] %v3597_v15 }
 0x1b8   : > { %956 = vrot.lane.b32.xlu1 %v2995_v47, %s2699_s5 }
 0x1b9   : > { %v3599_v5 = vpop.permute.xlu0 %842 }
 0x1ba   : > { %4938 = vst [vmem:[#allocation113_spill] sm:$0xff] %v3599_v5  ;;  %v3605_v3 = vpop.permute.xlu1 %844 }
 0x1bb   : > { %958 = vrot.lane.b32.xlu0 %v2997_v48, %s2699_s5  ;;  %4939 = vst [vmem:[#allocation114_spill] sm:$0xff] %v3605_v3 }
 0x1bc   : > { %960 = vrot.lane.b32.xlu1 %v3001_v51, %s2699_s5 }
 0x1bd   : > { %v3607_v24 = vpop.permute.xlu0 %846 }
 0x1be   : > { %4940 = vst [vmem:[#allocation115_spill] sm:$0xff] %v3607_v24  ;;  %v3613_v60 = vpop.permute.xlu1 %848 }
 0x1bf   : > { %962 = vrot.lane.b32.xlu0 %v3009_v10, %s2699_s5  ;;  %4941 = vst [vmem:[#allocation116_spill] sm:$0xff] %v3613_v60 }
 0x1c0   : > { %968 = vrot.lane.b32.xlu1 %v3031_v59, %s2699_s5 }
 0x1c1   : > { %v3615_v15 = vpop.permute.xlu0 %850 }
 0x1c2   : > { %4942 = vst [vmem:[#allocation117_spill] sm:$0xff] %v3615_v15  ;;  %v3621_v3 = vpop.permute.xlu1 %852 }
 0x1c3   : > { %984 = vrot.lane.b32.xlu0 %v2936_v63, %s2700_s12  ;;  %4943 = vst [vmem:[#allocation118_spill] sm:$0xff] %v3621_v3 }
 0x1c4   : > { %1000 = vrot.lane.b32.xlu1 %v2915_v27, %s2700_s12 }
 0x1c5   : > { %v3623_v24 = vpop.permute.xlu0 %854 }
 0x1c6   : > { %4944 = vst [vmem:[#allocation119_spill] sm:$0xff] %v3623_v24  ;;  %v3629_v60 = vpop.permute.xlu1 %856 }
 0x1c7   : > { %1016 = vrot.lane.b32.xlu0 %v2986_v17, %s2700_s12  ;;  %4945 = vst [vmem:[#allocation120_spill] sm:$0xff] %v3629_v60  ;;  %v1279_v17 = vrot.slane %v2988_v34, 6 }
 0x1c8   : > { %1032 = vrot.lane.b32.xlu1 %v3031_v59, %s2700_s12 }
 0x1c9   : > { %v3631_v15 = vpop.permute.xlu0 %858 }
 0x1ca   : > { %4946 = vst [vmem:[#allocation121_spill] sm:$0xff] %v3631_v15  ;;  %v3637_v5 = vpop.permute.xlu1 %860 }
 0x1cb   : > { %970 = vrot.lane.b32.xlu0 %v3035_v20, %s2699_s5  ;;  %4947 = vst [vmem:[#allocation122_spill] sm:$0xff] %v3637_v5 }
 0x1cc   : > { %986 = vrot.lane.b32.xlu1 %v2889_v12, %s2700_s12 }
 0x1cd   : > { %v3639_v3 = vpop.permute.xlu0 %862 }
 0x1ce   : > { %4948 = vst [vmem:[#allocation123_spill] sm:$0xff] %v3639_v3  ;;  %v3645_v24 = vpop.permute.xlu1 %864 }
 0x1cf   : > { %1002 = vrot.lane.b32.xlu0 %v2947_v9, %s2700_s12  ;;  %4949 = vst [vmem:[#allocation124_spill] sm:$0xff] %v3645_v24 }
 0x1d0   : > { %1018 = vrot.lane.b32.xlu1 %v2988_v34, %s2700_s12  ;;  %v1058_v34 = vrot.slane %v2891_v14, 3 }
 0x1d1   : > { %v3647_v60 = vpop.permute.xlu0 %866 }
 0x1d2   : > { %4950 = vst [vmem:[#allocation125_spill] sm:$0xff] %v3647_v60  ;;  %v3653_v15 = vpop.permute.xlu1 %868 }
 0x1d3   : > { %1034 = vrot.lane.b32.xlu0 %v3035_v20, %s2700_s12  ;;  %4951 = vst [vmem:[#allocation126_spill] sm:$0xff] %v3653_v15 }
 0x1d4   : > { %966 = vrot.lane.b32.xlu1 %v3026_v52, %s2699_s5 }
 0x1d5   : > { %v3655_v5 = vpop.permute.xlu0 %870 }
 0x1d6   : > { %4952 = vst [vmem:[#allocation127_spill] sm:$0xff] %v3655_v5  ;;  %v3661_v3 = vpop.permute.xlu1 %872 }
 0x1d7   : > { %972 = vrot.lane.b32.xlu0 %v3039_v26, %s2699_s5  ;;  %4953 = vst [vmem:[#allocation128_spill] sm:$0xff] %v3661_v3 }
 0x1d8   : > { %982 = vrot.lane.b32.xlu1 %v2881_v62, %s2700_s12 }
 0x1d9   : > { %v3663_v24 = vpop.permute.xlu0 %874 }
 0x1da   : > { %4954 = vst [vmem:[#allocation129_spill] sm:$0xff] %v3663_v24  ;;  %v3669_v60 = vpop.permute.xlu1 %876 }
 0x1db   : > { %988 = vrot.lane.b32.xlu0 %v2938_v2, %s2700_s12  ;;  %4955 = vst [vmem:[#allocation130_spill] sm:$0xff] %v3669_v60 }
 0x1dc   : > { %998 = vrot.lane.b32.xlu1 %v2885_v4, %s2700_s12 }
 0x1dd   : > { %v3671_v15 = vpop.permute.xlu0 %878 }
 0x1de   : > { %4956 = vst [vmem:[#allocation131_spill] sm:$0xff] %v3671_v15  ;;  %v3677_v5 = vpop.permute.xlu1 %880 }
 0x1df   : > { %1004 = vrot.lane.b32.xlu0 %v2956_v32, %s2700_s12  ;;  %4957 = vst [vmem:[#allocation132_spill] sm:$0xff] %v3677_v5 }
 0x1e0   : > { %1014 = vrot.lane.b32.xlu1 %v2982_v19, %s2700_s12 }
 0x1e1   : > { %v3679_v3 = vpop.permute.xlu0 %882 }
 0x1e2   : > { %4958 = vst [vmem:[#allocation133_spill] sm:$0xff] %v3679_v3  ;;  %v3685_v24 = vpop.permute.xlu1 %884 }
 0x1e3   : > { %1020 = vrot.lane.b32.xlu0 %v2995_v47, %s2700_s12  ;;  %4959 = vst [vmem:[#allocation134_spill] sm:$0xff] %v3685_v24 }
 0x1e4   : > { %1030 = vrot.lane.b32.xlu1 %v3026_v52, %s2700_s12 }
 0x1e5   : > { %v3687_v60 = vpop.permute.xlu0 %886 }
 0x1e6   : > { %4960 = vst [vmem:[#allocation135_spill] sm:$0xff] %v3687_v60  ;;  %v3693_v15 = vpop.permute.xlu1 %888 }
 0x1e7   : > { %1036 = vrot.lane.b32.xlu0 %v3039_v26, %s2700_s12  ;;  %4961 = vst [vmem:[#allocation136_spill] sm:$0xff] %v3693_v15 }
 0x1e8   : > { %974 = vrot.lane.b32.xlu1 %v3043_v31, %s2699_s5 }
 0x1e9   : > { %v3695_v5 = vpop.permute.xlu0 %890 }
 0x1ea   : > { %4962 = vst [vmem:[#allocation137_spill] sm:$0xff] %v3695_v5  ;;  %v3701_v3 = vpop.permute.xlu1 %892 }
 0x1eb   : > { %990 = vrot.lane.b32.xlu0 %v2883_v1, %s2700_s12  ;;  %4963 = vst [vmem:[#allocation138_spill] sm:$0xff] %v3701_v3 }
 0x1ec   : > { %1006 = vrot.lane.b32.xlu1 %v2897_v22, %s2700_s12 }
 0x1ed   : > { %v3703_v24 = vpop.permute.xlu0 %894 }
 0x1ee   : > { %4964 = vst [vmem:[#allocation139_spill] sm:$0xff] %v3703_v24  ;;  %v3709_v60 = vpop.permute.xlu1 %896 }
 0x1ef   : > { %1022 = vrot.lane.b32.xlu0 %v2997_v48, %s2700_s12  ;;  %4965 = vst [vmem:[#allocation140_spill] sm:$0xff] %v3709_v60 }
 0x1f0   : > { %1038 = vrot.lane.b32.xlu1 %v3043_v31, %s2700_s12 }
 0x1f1   : > { %v3711_v15 = vpop.permute.xlu0 %898 }
 0x1f2   : > { %4966 = vst [vmem:[#allocation141_spill] sm:$0xff] %v3711_v15  ;;  %v3717_v5 = vpop.permute.xlu1 %900 }
 0x1f3   : > { %976 = vrot.lane.b32.xlu0 %v3047_v35, %s2699_s5  ;;  %4967 = vst [vmem:[#allocation142_spill] sm:$0xff] %v3717_v5 }
 0x1f4   : > { %992 = vrot.lane.b32.xlu1 %v2891_v14, %s2700_s12 }
 0x1f5   : > { %v903_v3 = vpop.permute.xlu0 %902 }
 0x1f6   : > { %v905_v24 = vpop.permute.xlu1 %904 }
 0x1f7   : > { %1008 = vrot.lane.b32.xlu0 %v2921_v16, %s2700_s12  ;;  %v1459_v0 = vrot.slane %v905_v24, 7 }
 0x1f8   : > { %1024 = vrot.lane.b32.xlu1 %v3001_v51, %s2700_s12 }
 0x1f9   : > { %v907_v60 = vpop.permute.xlu0 %906  ;;  %v1460_v15 = vsel %vm1047_vm1, %v1459_v0, %v903_v3 }
 0x1fa   : > { %v1461_v36 = vrot.slane %v907_v60, 6  ;;  %v909_v5 = vpop.permute.xlu1 %908 }
 0x1fb   : > { %1040 = vrot.lane.b32.xlu0 %v3047_v35, %s2700_s12  ;;  %v1463_v13 = vrot.slane %v909_v5, 5 }
 0x1fc   : > { %v1462_v21 = vsel %vm1050_vm2, %v1461_v36, %v1460_v15  ;;  %978 = vrot.lane.b32.xlu1 %v3051_v37, %s2699_s5 }
 0x1fd   : > { %v911_v58 = vpop.permute.xlu0 %910  ;;  %v1464_v24 = vsel %vm1053_vm3, %v1463_v13, %v1462_v21 }
 0x1fe   : > { %v1465_v55 = vrot.slane %v911_v58, 4  ;;  %v913_v0 = vpop.permute.xlu1 %912 }
 0x1ff   : > { %994 = vrot.lane.b32.xlu0 %v2942_v23, %s2700_s12  ;;  %v1467_v60 = vrot.slane %v913_v0, 3  ;;  %v1046_v0 = vrot.slane %v2936_v63, 7  ;;  %v1165_v63 = vrot.slane %v2915_v27, 7 }
 0x200   : > { %v1466_v3 = vsel %vm1056_vm4, %v1465_v55, %v1464_v24  ;;  %1010 = vrot.lane.b32.xlu1 %v2958_v33, %s2700_s12 }
 0x201   : > { %v915_v25 = vpop.permute.xlu0 %914  ;;  %v1468_v5 = vsel %vm1059_vm5, %v1467_v60, %v1466_v3 }
 0x202   : > { %v1469_v15 = vrot.slane %v915_v25, 2  ;;  %v917_v58 = vpop.permute.xlu1 %916 }
 0x203   : > { %1026 = vrot.lane.b32.xlu0 %v3009_v10, %s2700_s12  ;;  %v1471_v13 = vrot.slane %v917_v58, 1  ;;  %v1049_v58 = vrot.slane %v2889_v12, 6 }
 0x204   : > { %v1470_v21 = vsel %vm1062_vm6, %v1469_v15, %v1468_v5  ;;  %1042 = vrot.lane.b32.xlu1 %v3051_v37, %s2700_s12 }
 0x205   : > { %v919_v36 = vpop.permute.xlu0 %918  ;;  %v3744_v55 = vsel %vm1065_vm7, %v1471_v13, %v1470_v21 }
 0x206   : > { %4968 = vst [vmem:[#allocation143_spill] sm:$0xff] %v3744_v55  ;;  %v921_v25 = vpop.permute.xlu1 %920 }
 0x207   : > { %964 = vrot.lane.b32.xlu0 %v3015_v7, %s2699_s5  ;;  %v1137_v24 = vrot.slane %v921_v25, 7  ;;  %v1048_v25 = vsel %vm1047_vm1, %v1046_v0, %v2881_v62  ;;  %v1167_v62 = vrot.slane %v2947_v9, 6 }
 0x208   : > { %980 = vrot.lane.b32.xlu1 %v3055_v38, %s2699_s5 }
 0x209   : > { %v923_v3 = vpop.permute.xlu0 %922  ;;  %v1138_v60 = vsel %vm1047_vm1, %v1137_v24, %v919_v36 }
 0x20a   : > { %v1139_v5 = vrot.slane %v923_v3, 6  ;;  %v925_v15 = vpop.permute.xlu1 %924  ;;  %v1052_v3 = vrot.slane %v2938_v2, 5  ;;  %v1055_v2 = vrot.slane %v2883_v1, 4 }
 0x20b   : > { %996 = vrot.lane.b32.xlu0 %v2950_v29, %s2700_s12  ;;  %v1141_v13 = vrot.slane %v925_v15, 5 }
 0x20c   : > { %v1140_v21 = vsel %vm1050_vm2, %v1139_v5, %v1138_v60  ;;  %1012 = vrot.lane.b32.xlu1 %v2969_v46, %s2700_s12  ;;  %v1051_v60 = vsel %vm1050_vm2, %v1049_v58, %v1048_v25  ;;  %v1166_v5 = vsel %vm1047_vm1, %v1165_v63, %v2885_v4  ;;  %v1278_v4 = vsel %vm1047_vm1, %v1277_v28, %v2982_v19 }
 0x20d   : > { %v927_v55 = vpop.permute.xlu0 %926  ;;  %v1142_v36 = vsel %vm1053_vm3, %v1141_v13, %v1140_v21  ;;  %v1054_v9 = vsel %vm1053_vm3, %v1052_v3, %v1051_v60  ;;  %v1169_v13 = vrot.slane %v2956_v32, 5  ;;  %v1391_v63 = vrot.slane %v3035_v20, 6 }
 0x20e   : > { %v1143_v24 = vrot.slane %v927_v55, 4  ;;  %v929_v12 = vpop.permute.xlu1 %928  ;;  %v1389_v55 = vrot.slane %v3031_v59, 7  ;;  %v1168_v59 = vsel %vm1050_vm2, %v1167_v62, %v1166_v5  ;;  %v1057_v32 = vsel %vm1056_vm4, %v1055_v2, %v1054_v9 }
 0x20f   : > { %1028 = vrot.lane.b32.xlu0 %v3015_v7, %s2700_s12  ;;  %v1145_v0 = vrot.slane %v929_v12, 3  ;;  %v1171_v19 = vrot.slane %v2897_v22, 4  ;;  %v1280_v28 = vsel %vm1050_vm2, %v1279_v17, %v1278_v4  ;;  %v1170_v20 = vsel %vm1053_vm3, %v1169_v13, %v1168_v59 }
 0x210   : > { %v1144_v27 = vsel %vm1056_vm4, %v1143_v24, %v1142_v36  ;;  %1044 = vrot.lane.b32.xlu1 %v3055_v38, %s2700_s12  ;;  %v1281_v24 = vrot.slane %v2995_v47, 5  ;;  %v1390_v3 = vsel %vm1047_vm1, %v1389_v55, %v3026_v52  ;;  %v1393_v62 = vrot.slane %v3039_v26, 5 }
 0x211   : > { %v931_v15 = vpop.permute.xlu0 %930  ;;  %v1146_v58 = vsel %vm1059_vm5, %v1145_v0, %v1144_v27  ;;  %v1283_v47 = vrot.slane %v2997_v48, 4  ;;  %v1392_v27 = vsel %vm1050_vm2, %v1391_v63, %v1390_v3  ;;  %v1061_v0 = vrot.slane %v2942_v23, 2 }
 0x212   : > { %v1147_v21 = vrot.slane %v931_v15, 2  ;;  %v933_v25 = vpop.permute.xlu1 %932  ;;  %v1060_v5 = vsel %vm1059_vm5, %v1058_v34, %v1057_v32  ;;  %v1173_v22 = vrot.slane %v2921_v16, 3  ;;  %v1282_v55 = vsel %vm1053_vm3, %v1281_v24, %v1280_v28 }
 0x213   : > { %v1149_v1 = vrot.slane %v933_v25, 1  ;;  %v1172_v2 = vsel %vm1056_vm4, %v1171_v19, %v1170_v20  ;;  %v1395_v17 = vrot.slane %v3043_v31, 4  ;;  %v1067_v48 = vrot.slane %v3143_v50, 7 }
 0x214   : > { %v1148_v36 = vsel %vm1062_vm6, %v1147_v21, %v1146_v58  ;;  %v1285_v21 = vrot.slane %v3001_v51, 3  ;;  %v1394_v23 = vsel %vm1053_vm3, %v1393_v62, %v1392_v27  ;;  %v1064_v13 = vrot.slane %v2950_v29, 1 }
 0x215   : > { %v935_v12 = vpop.permute.xlu0 %934  ;;  %v3792_v60 = vsel %vm1065_vm7, %v1149_v1, %v1148_v36  ;;  %v1284_v16 = vsel %vm1056_vm4, %v1283_v47, %v1282_v55  ;;  %v1063_v59 = vsel %vm1062_vm6, %v1061_v0, %v1060_v5  ;;  %v1174_v31 = vsel %vm1059_vm5, %v1173_v22, %v1172_v2 }
 0x216   : > { %v937_v14 = vpop.permute.xlu1 %936  ;;  %v1175_v63 = vrot.slane %v2958_v33, 2  ;;  %v1397_v50 = vrot.slane %v3047_v35, 3  ;;  %v1287_v51 = vrot.slane %v3009_v10, 2  ;;  %v1396_v1 = vsel %vm1056_vm4, %v1395_v17, %v1394_v23 }
 0x217   : > { %v1249_v52 = vrot.slane %v937_v14, 7  ;;  %v1179_v24 = vrot.slane %v3133_v44, 7  ;;  %v1068_v3 = vsel %vm1047_vm1, %v1067_v48, %v3111_v39  ;;  %v1399_v32 = vrot.slane %v3051_v37, 2 }
 0x218   : > { %v1069_v35 = vrot.slane %v3117_v40, 6  ;;  %v1181_v19 = vrot.slane %v3159_v56, 6  ;;  %v1071_v20 = vrot.slane %v3149_v53, 5  ;;  %v1176_v62 = vsel %vm1062_vm6, %v1175_v63, %v1174_v31 }
 0x219   : > { %v939_v15 = vpop.permute.xlu0 %938  ;;  %v1250_v26 = vsel %vm1047_vm1, %v1249_v52, %v935_v12  ;;  %v1286_v12 = vsel %vm1059_vm5, %v1285_v21, %v1284_v16  ;;  %v1177_v44 = vrot.slane %v2969_v46, 1  ;;  %v1398_v39 = vsel %vm1059_vm5, %v1397_v50, %v1396_v1  ;;  %v4972_v1 = vld [vmem:[#allocation17_spill] sm:$0xff] }
 0x21a   : > { %v1251_v58 = vrot.slane %v939_v15, 6  ;;  %v941_v9 = vpop.permute.xlu1 %940  ;;  %v1070_v47 = vsel %vm1050_vm2, %v1069_v35, %v1068_v3  ;;  %v1289_v37 = vrot.slane %v3015_v7, 1  ;;  %v1180_v56 = vsel %vm1047_vm1, %v1179_v24, %v3127_v43  ;;  %v4973_v24 = vld [vmem:[#allocation24_spill] sm:$0xff] }
 0x21b   : > { %v1253_v25 = vrot.slane %v941_v9, 5  ;;  %v1183_v52 = vrot.slane %v3165_v57, 5  ;;  %v1288_v53 = vsel %vm1062_vm6, %v1287_v51, %v1286_v12  ;;  %v1401_v0 = vrot.slane %v3055_v38, 1 }
 0x21c   : > { %v1252_v4 = vsel %vm1050_vm2, %v1251_v58, %v1250_v26  ;;  %v1182_v5 = vsel %vm1050_vm2, %v1181_v19, %v1180_v56  ;;  %v1400_v22 = vsel %vm1062_vm6, %v1399_v32, %v1398_v39  ;;  %v1072_v15 = vsel %vm1053_vm3, %v1071_v20, %v1070_v47  ;;  %v4974_v32 = vld [vmem:[#allocation10_spill] sm:$0xff]  ;;  %v4975_v19 = vld [vmem:[#allocation11_spill] sm:$0xff]  ;;  %v4977_v20 = vld [vmem:[#allocation13_spill] sm:$0xff] }
 0x21d   : > { %v943_v36 = vpop.permute.xlu0 %942  ;;  %v1254_v29 = vsel %vm1053_vm3, %v1253_v25, %v1252_v4  ;;  %v1291_v2 = vrot.slane %v3181_v6, 7  ;;  %v3844_v43 = vsel %vm1065_vm7, %v1064_v13, %v1063_v59  ;;  %v1073_v17 = vrot.slane %v3119_v41, 4  ;;  %v4979_v56 = vld [vmem:[#allocation25_spill] sm:$0xff] }
 0x21e   : > { %v1255_v34 = vrot.slane %v943_v36, 4  ;;  %v945_v33 = vpop.permute.xlu1 %944  ;;  %4969 = vst [vmem:[#allocation144_spill] sm:$0xff] %v3844_v43  ;;  %v3848_v38 = vsel %vm1065_vm7, %v1177_v44, %v1176_v62  ;;  %v1184_v58 = vsel %vm1053_vm3, %v1183_v52, %v1182_v5  ;;  %v1403_v48 = vrot.slane %v3213_v30, 7  ;;  %v4981_v5 = vld [vmem:[#allocation32_spill] sm:$0xff] }
 0x21f   : > { %v1257_v28 = vrot.slane %v945_v33, 3  ;;  %4970 = vst [vmem:[#allocation145_spill] sm:$0xff] %v3848_v38  ;;  %v3856_v21 = vsel %vm1065_vm7, %v1289_v37, %v1288_v53  ;;  %v3859_v6 = vsel %vm1065_vm7, %v1401_v0, %v1400_v22  ;;  %v1185_v9 = vrot.slane %v3135_v45, 4  ;;  %v4980_v0 = vld [vmem:[#allocation23_spill] sm:$0xff] }
 0x220   : > { %v1256_v10 = vsel %vm1056_vm4, %v1255_v34, %v1254_v29  ;;  %4971 = vst [vmem:[#allocation146_spill] sm:$0xff] %v3856_v21  ;;  %v1074_v41 = vsel %vm1056_vm4, %v1073_v17, %v1072_v15  ;;  %v1293_v13 = vrot.slane %v3183_v11, 6  ;;  %v1075_v4 = vrot.slane %v3125_v42, 3  ;;  %v4983_v17 = vld [vmem:[#allocation14_spill] sm:$0xff] }
 0x221   : > { %v947_v14 = vpop.permute.xlu0 %946  ;;  %v1258_v40 = vsel %vm1059_vm5, %v1257_v28, %v1256_v10  ;;  %v1187_v25 = vrot.slane %v3141_v49, 3  ;;  %v1292_v30 = vsel %vm1047_vm1, %v1291_v2, %v3175_v61  ;;  %v2701_v31 = vmov 1934713408   ;;  %v4982_v2 = vld [vmem:[#allocation12_spill] sm:$0xff] }
 0x222   : > { %v1259_v27 = vrot.slane %v947_v14, 2  ;;  %v949_v46 = vpop.permute.xlu1 %948  ;;  %v3868_v63 = vunpack.c.l.s4 %v2701_v31  ;;  %v1186_v50 = vsel %vm1056_vm4, %v1185_v9, %v1184_v58  ;;  %v1405_v45 = vrot.slane %v3215_v8, 6 }
 0x223   : > { %v1261_v7 = vrot.slane %v949_v46, 1  ;;  %v1076_v11 = vsel %vm1059_vm5, %v1075_v4, %v1074_v41  ;;  %v1077_v42 = vrot.slane %v3151_v54, 2  ;;  %v1295_v49 = vrot.slane %v3189_v18, 5  ;;  %v4976_v54 = vld [vmem:[#allocation18_spill] sm:$0xff] }
 0x224   : > { %v1260_v55 = vsel %vm1062_vm6, %v1259_v27, %v1258_v40  ;;  %v1404_v61 = vsel %vm1047_vm1, %v1403_v48, %v4972_v1  ;;  %v1294_v34 = vsel %vm1050_vm2, %v1293_v13, %v1292_v30  ;;  %v1081_v3 = vrot.slane %v4973_v24, 7  ;;  %v4978_v40 = vld [vmem:[#allocation19_spill] sm:$0xff]  ;;  %v4984_v41 = vld [vmem:[#allocation26_spill] sm:$0xff]  ;;  %v4989_v1 = vld [vmem:[#allocation40_spill] sm:$0xff] }
 0x225   : > { %v951_v57 = vpop.permute.xlu0 %950  ;;  %v3851_v26 = vsel %vm1065_vm7, %v1261_v7, %v1260_v55  ;;  %v1079_v33 = vrot.slane %v4974_v32, 1  ;;  %v1188_v35 = vsel %vm1059_vm5, %v1187_v25, %v1186_v50  ;;  %v1189_v10 = vrot.slane %v4975_v19, 2  ;;  %v4985_v25 = vld [vmem:[#allocation15_spill] sm:$0xff]  ;;  %v4994_v19 = vld [vmem:[#allocation21_spill] sm:$0xff] }
 0x226   : > { %v953_v23 = vpop.permute.xlu1 %952  ;;  %v1407_v28 = vrot.slane %v4976_v54, 5  ;;  %v1297_v62 = vrot.slane %v4977_v20, 4  ;;  %v1406_v44 = vsel %vm1050_vm2, %v1405_v45, %v1404_v61  ;;  %v1078_v47 = vsel %vm1062_vm6, %v1077_v42, %v1076_v11  ;;  %v4987_v45 = vld [vmem:[#allocation33_spill] sm:$0xff]  ;;  %v4988_v42 = vld [vmem:[#allocation31_spill] sm:$0xff] }
 0x227   : > { %v1361_v16 = vrot.slane %v953_v23, 7  ;;  %v1296_v37 = vsel %vm1053_vm3, %v1295_v49, %v1294_v34  ;;  %v1409_v27 = vrot.slane %v4978_v40, 4  ;;  %v1083_v52 = vrot.slane %v4979_v56, 6  ;;  %v4998_v40 = vld [vmem:[#allocation28_spill] sm:$0xff]  ;;  %v4999_v56 = vld [vmem:[#allocation39_spill] sm:$0xff] }
 0x228   : > { %v1082_v46 = vsel %vm1047_vm1, %v1081_v3, %v4980_v0  ;;  %v1193_v22 = vrot.slane %v4981_v5, 7  ;;  %v1190_v15 = vsel %vm1062_vm6, %v1189_v10, %v1188_v35  ;;  %v1299_v58 = vrot.slane %v4983_v17, 3  ;;  %v4992_v3 = vld [vmem:[#allocation27_spill] sm:$0xff] }
 0x229   : > { %v955_v59 = vpop.permute.xlu0 %954  ;;  %v1362_v36 = vsel %vm1047_vm1, %v1361_v16, %v951_v57  ;;  %v1191_v57 = vrot.slane %v4982_v2, 1  ;;  %v1408_v48 = vsel %vm1053_vm3, %v1407_v28, %v1406_v44  ;;  %v1298_v9 = vsel %vm1056_vm4, %v1297_v62, %v1296_v37  ;;  %v4995_v28 = vld [vmem:[#allocation34_spill] sm:$0xff]  ;;  %v4996_v62 = vld [vmem:[#allocation41_spill] sm:$0xff] }
 0x22a   : > { %v1363_v51 = vrot.slane %v955_v59, 6  ;;  %v957_v29 = vpop.permute.xlu1 %956  ;;  %v1085_v13 = vrot.slane %v4984_v41, 5  ;;  %v1301_v30 = vrot.slane %v4985_v25, 2  ;;  %v4986_v59 = vld [vmem:[#allocation20_spill] sm:$0xff]  ;;  %v1084_v50 = vsel %vm1050_vm2, %v1083_v52, %v1082_v46  ;;  %v5007_v25 = vld [vmem:[#allocation49_spill] sm:$0xff] }
 0x22b   : > { %v1365_v8 = vrot.slane %v957_v29, 5  ;;  %v1411_v31 = vrot.slane %v4986_v59, 3  ;;  %v1410_v11 = vsel %vm1056_vm4, %v1409_v27, %v1408_v48  ;;  %v1194_v49 = vsel %vm1047_vm1, %v1193_v22, %v4988_v42  ;;  %v5001_v46 = vld [vmem:[#allocation16_spill] sm:$0xff]  ;;  %v5004_v48 = vld [vmem:[#allocation42_spill] sm:$0xff]  ;;  %v5008_v59 = vld [vmem:[#allocation55_spill] sm:$0xff] }
 0x22c   : > { %v1364_v12 = vsel %vm1050_vm2, %v1363_v51, %v1362_v36  ;;  %v1195_v36 = vrot.slane %v4987_v45, 6  ;;  %v1305_v61 = vrot.slane %v4989_v1, 7  ;;  %v3917_v34 = vsel %vm1065_vm7, %v1079_v33, %v1078_v47  ;;  %v5010_v42 = vld [vmem:[#allocation47_spill] sm:$0xff]  ;;  %v5011_v1 = vld [vmem:[#allocation65_spill] sm:$0xff] }
 0x22d   : > { %v959_v18 = vpop.permute.xlu0 %958  ;;  %v1366_v39 = vsel %vm1053_vm3, %v1365_v8, %v1364_v12  ;;  %4991 = vst [vmem:[#allocation24_spill] sm:$0xff] %v3917_v34  ;;  %v1300_v24 = vsel %vm1059_vm5, %v1299_v58, %v1298_v9  ;;  %v1087_v12 = vrot.slane %v4992_v3, 4  ;;  %v1601_v32 = vunpack.c.0.s8 %v3868_v63  ;;  %v5005_v9 = vld [vmem:[#allocation57_spill] sm:$0xff]  ;;  %v5012_v3 = vld [vmem:[#allocation43_spill] sm:$0xff] }
 0x22e   : > { %v1367_v14 = vrot.slane %v959_v18, 4  ;;  %v961_v53 = vpop.permute.xlu1 %960  ;;  %v3925_v35 = vsel %vm1065_vm7, %v1191_v57, %v1190_v15  ;;  %v1413_v10 = vrot.slane %v4994_v19, 2  ;;  %v1086_v54 = vsel %vm1053_vm3, %v1085_v13, %v1084_v50  ;;  %v5003_v15 = vld [vmem:[#allocation64_spill] sm:$0xff]  ;;  %v5006_v13 = vld [vmem:[#allocation29_spill] sm:$0xff]  ;;  %v5013_v19 = vld [vmem:[#allocation58_spill] sm:$0xff] }
 0x22f   : > { %v1369_v7 = vrot.slane %v961_v53, 3  ;;  %4993 = vst [vmem:[#allocation10_spill] sm:$0xff] %v3925_v35  ;;  %v1197_v18 = vrot.slane %v4995_v28, 5  ;;  %v1412_v33 = vsel %vm1059_vm5, %v1411_v31, %v1410_v11  ;;  %v1196_v20 = vsel %vm1050_vm2, %v1195_v36, %v1194_v49  ;;  %v5000_v53 = vld [vmem:[#allocation48_spill] sm:$0xff] }
 0x230   : > { %v1368_v55 = vsel %vm1056_vm4, %v1367_v14, %v1366_v39  ;;  %v1307_v44 = vrot.slane %v4996_v62, 6  ;;  %v4997_v39 = vld [vmem:[#allocation56_spill] sm:$0xff]  ;;  %v3937_v37 = vsel %vm1062_vm6, %v1301_v30, %v1300_v24  ;;  %v1089_v27 = vrot.slane %v4998_v40, 3 }
 0x231   : > { %v963_v23 = vpop.permute.xlu0 %962  ;;  %v1370_v16 = vsel %vm1059_vm5, %v1369_v7, %v1368_v55  ;;  %v1095_v14 = vrot.slane %v4997_v39, 7  ;;  %v1306_v52 = vsel %vm1047_vm1, %v1305_v61, %v4999_v56  ;;  %v1417_v0 = vrot.slane %v5000_v53, 7  ;;  %v5002_v55 = vld [vmem:[#allocation35_spill] sm:$0xff]  ;;  %v5009_v36 = vld [vmem:[#allocation36_spill] sm:$0xff]  ;;  %v5018_v53 = vld [vmem:[#allocation66_spill] sm:$0xff] }
 0x232   : > { %v1371_v4 = vrot.slane %v963_v23, 2  ;;  %v3907_v51 = vpop.permute.xlu1 %968  ;;  %v1303_v5 = vrot.slane %v5001_v46, 1  ;;  %v1088_v22 = vsel %vm1056_vm4, %v1087_v12, %v1086_v54  ;;  %v1199_v7 = vrot.slane %v5002_v55, 4  ;;  %v5014_v54 = vld [vmem:[#allocation63_spill] sm:$0xff]  ;;  %v5016_v39 = vld [vmem:[#allocation72_spill] sm:$0xff] }
 0x233   : > { %v1207_v2 = vrot.slane %v5003_v15, 7  ;;  %v3950_v17 = vsel %vm1062_vm6, %v1413_v10, %v1412_v33  ;;  %v1198_v58 = vsel %vm1053_vm3, %v1197_v18, %v1196_v20  ;;  %v1309_v23 = vrot.slane %v5004_v48, 5  ;;  %v5015_v20 = vld [vmem:[#allocation50_spill] sm:$0xff]  ;;  %v5068_v46 = vld [vmem:[#allocation96_spill] sm:$0xff] }
 0x234   : > { %v3914_v29 = vsel %vm1062_vm6, %v1371_v4, %v1370_v16  ;;  %v1097_v41 = vrot.slane %v5005_v9, 6  ;;  %v1091_v16 = vrot.slane %v5006_v13, 2  ;;  %v1308_v4 = vsel %vm1050_vm2, %v1307_v44, %v1306_v52  ;;  %v5021_v9 = vld [vmem:[#allocation51_spill] sm:$0xff] }
 0x235   : > { %4990 = vst [vmem:[#allocation17_spill] sm:$0xff] %v3914_v29  ;;  %v3921_v8 = vpop.permute.xlu0 %984  ;;  %v1419_v30 = vrot.slane %v5007_v25, 6  ;;  %v1096_v31 = vsel %vm1047_vm1, %v1095_v14, %v5008_v59  ;;  %v1090_v45 = vsel %vm1059_vm5, %v1089_v27, %v1088_v22  ;;  %v1201_v11 = vrot.slane %v5009_v36, 3  ;;  %v5017_v27 = vld [vmem:[#allocation37_spill] sm:$0xff]  ;;  %v5023_v59 = vld [vmem:[#allocation67_spill] sm:$0xff]  ;;  %v5096_v29 = vld [vmem:[#allocation100_spill] sm:$0xff] }
 0x236   : > { %v3934_v47 = vpop.permute.xlu1 %1000  ;;  %v1418_v49 = vsel %vm1047_vm1, %v1417_v0, %v5010_v42  ;;  %v1209_v61 = vrot.slane %v5011_v1, 6  ;;  %v1200_v24 = vsel %vm1056_vm4, %v1199_v7, %v1198_v58  ;;  %v1311_v12 = vrot.slane %v5012_v3, 4  ;;  %v5019_v7 = vld [vmem:[#allocation44_spill] sm:$0xff] }
 0x237   : > { %v1099_v10 = vrot.slane %v5013_v19, 5  ;;  %v1208_v28 = vsel %vm1047_vm1, %v1207_v2, %v5014_v54  ;;  %v1310_v33 = vsel %vm1053_vm3, %v1309_v23, %v1308_v4  ;;  %v1421_v62 = vrot.slane %v5015_v20, 5  ;;  %v5020_v2 = vld [vmem:[#allocation59_spill] sm:$0xff]  ;;  %v5029_v20 = vld [vmem:[#allocation74_spill] sm:$0xff] }
 0x238   : > { %v1098_v44 = vsel %vm1050_vm2, %v1097_v41, %v1096_v31  ;;  %v1319_v14 = vrot.slane %v5016_v39, 7  ;;  %v3977_v40 = vsel %vm1062_vm6, %v1091_v16, %v1090_v45  ;;  %v1203_v56 = vrot.slane %v5017_v27, 2  ;;  %v5022_v16 = vld [vmem:[#allocation73_spill] sm:$0xff]  ;;  %v5024_v45 = vld [vmem:[#allocation71_spill] sm:$0xff]  ;;  %v5030_v39 = vld [vmem:[#allocation68_spill] sm:$0xff] }
 0x239   : > { %v3947_v57 = vpop.permute.xlu0 %1016  ;;  %v1420_v52 = vsel %vm1050_vm2, %v1419_v30, %v1418_v49  ;;  %v1211_v0 = vrot.slane %v5018_v53, 5  ;;  %v1202_v55 = vsel %vm1059_vm5, %v1201_v11, %v1200_v24  ;;  %v1313_v15 = vrot.slane %v5019_v7, 3  ;;  %v5025_v11 = vld [vmem:[#allocation80_spill] sm:$0xff]  ;;  %v5026_v49 = vld [vmem:[#allocation30_spill] sm:$0xff] }
 0x23a   : > { %v3960_v50 = vpop.permute.xlu1 %1032  ;;  %v1101_v58 = vrot.slane %v5020_v2, 4  ;;  %v1210_v48 = vsel %vm1050_vm2, %v1209_v61, %v1208_v28  ;;  %v1312_v23 = vsel %vm1056_vm4, %v1311_v12, %v1310_v33  ;;  %v1423_v41 = vrot.slane %v5021_v9, 4  ;;  %v5027_v24 = vld [vmem:[#allocation60_spill] sm:$0xff]  ;;  %v5033_v2 = vld [vmem:[#allocation79_spill] sm:$0xff] }
 0x23b   : > { %v1100_v13 = vsel %vm1053_vm3, %v1099_v10, %v1098_v44  ;;  %v1321_v4 = vrot.slane %v5022_v16, 6  ;;  %v1422_v30 = vsel %vm1053_vm3, %v1421_v62, %v1420_v52  ;;  %v1213_v31 = vrot.slane %v5023_v59, 4  ;;  %v5028_v10 = vld [vmem:[#allocation38_spill] sm:$0xff] }
 0x23c   : > { %v1320_v36 = vsel %vm1047_vm1, %v1319_v14, %v5024_v45  ;;  %v1431_v42 = vrot.slane %v5025_v11, 7  ;;  %v1093_v1 = vrot.slane %v5026_v49, 1  ;;  %v1204_v61 = vsel %vm1062_vm6, %v1203_v56, %v1202_v55  ;;  %v5031_v56 = vld [vmem:[#allocation81_spill] sm:$0xff]  ;;  %v5038_v49 = vld [vmem:[#allocation88_spill] sm:$0xff] }
 0x23d   : > { %v971_v18 = vpop.permute.xlu0 %970  ;;  %v1103_v3 = vrot.slane %v5027_v24, 3  ;;  %v1212_v12 = vsel %vm1053_vm3, %v1211_v0, %v1210_v48  ;;  %v1205_v54 = vrot.slane %v5028_v10, 1  ;;  %v1314_v28 = vsel %vm1059_vm5, %v1313_v15, %v1312_v23  ;;  %v5032_v0 = vld [vmem:[#allocation52_spill] sm:$0xff]  ;;  %v5034_v23 = vld [vmem:[#allocation61_spill] sm:$0xff] }
 0x23e   : > { %v3982_v22 = vpop.permute.xlu1 %986  ;;  %v1102_v33 = vsel %vm1056_vm4, %v1101_v58, %v1100_v13  ;;  %v1323_v62 = vrot.slane %v5029_v20, 5  ;;  %v1424_v44 = vsel %vm1056_vm4, %v1423_v41, %v1422_v30  ;;  %v1215_v14 = vrot.slane %v5030_v39, 3  ;;  %v5035_v41 = vld [vmem:[#allocation75_spill] sm:$0xff]  ;;  %v5036_v30 = vld [vmem:[#allocation69_spill] sm:$0xff]  ;;  %v5042_v39 = vld [vmem:[#allocation76_spill] sm:$0xff] }
 0x23f   : > { %v1322_v27 = vsel %vm1050_vm2, %v1321_v4, %v1320_v36  ;;  %v1433_v52 = vrot.slane %v5031_v56, 6  ;;  %v1425_v55 = vrot.slane %v5032_v0, 3  ;;  %v1214_v7 = vsel %vm1056_vm4, %v1213_v31, %v1212_v12  ;;  %v5037_v36 = vld [vmem:[#allocation82_spill] sm:$0xff]  ;;  %v5041_v20 = vld [vmem:[#allocation53_spill] sm:$0xff] }
 0x240   : > { %v1432_v15 = vsel %vm1047_vm1, %v1431_v42, %v5033_v2  ;;  %v1473_v58 = vrot.slane %v3907_v51, 7  ;;  %v1104_v48 = vsel %vm1059_vm5, %v1103_v3, %v1102_v33  ;;  %v1105_v9 = vrot.slane %v5034_v23, 2  ;;  %v5043_v56 = vld [vmem:[#allocation62_spill] sm:$0xff]  ;;  %v5045_v2 = vld [vmem:[#allocation83_spill] sm:$0xff] }
 0x241   : > { %v3992_v25 = vpop.permute.xlu0 %1002  ;;  %v1325_v13 = vrot.slane %v5035_v41, 4  ;;  %v1475_v16 = vrot.slane %v971_v18, 6  ;;  %v1217_v59 = vrot.slane %v5036_v30, 2  ;;  %v1324_v45 = vsel %vm1053_vm3, %v1323_v62, %v1322_v27  ;;  %v5040_v18 = vld [vmem:[#allocation45_spill] sm:$0xff] }
 0x242   : > { %v4003_v19 = vpop.permute.xlu1 %1018  ;;  %v1435_v11 = vrot.slane %v5037_v36, 5  ;;  %v1216_v42 = vsel %vm1059_vm5, %v1215_v14, %v1214_v7  ;;  %v1434_v51 = vsel %vm1050_vm2, %v1433_v52, %v1432_v15  ;;  %v1109_v24 = vrot.slane %v5038_v49, 7  ;;  %v5044_v14 = vld [vmem:[#allocation70_spill] sm:$0xff]  ;;  %v5049_v49 = vld [vmem:[#allocation77_spill] sm:$0xff] }
 0x243   : > { %v1315_v10 = vrot.slane %v5040_v18, 2  ;;  %v1426_v33 = vsel %vm1059_vm5, %v1425_v55, %v1424_v44  ;;  %v1427_v62 = vrot.slane %v5041_v20, 2  ;;  %v1327_v27 = vrot.slane %v5042_v39, 3  ;;  %v5046_v55 = vld [vmem:[#allocation89_spill] sm:$0xff]  ;;  %v5048_v36 = vld [vmem:[#allocation54_spill] sm:$0xff]  ;;  %v5050_v20 = vld [vmem:[#allocation87_spill] sm:$0xff] }
 0x244   : > { %v1107_v0 = vrot.slane %v5043_v56, 1  ;;  %v1219_v7 = vrot.slane %v5044_v14, 1  ;;  %v1326_v52 = vsel %vm1056_vm4, %v1325_v13, %v1324_v45  ;;  %v1437_v15 = vrot.slane %v5045_v2, 4  ;;  %v5054_v14 = vld [vmem:[#allocation90_spill] sm:$0xff] }
 0x245   : > { %v4013_v53 = vpop.permute.xlu0 %1034  ;;  %v1106_v23 = vsel %vm1062_vm6, %v1105_v9, %v1104_v48  ;;  %v1218_v41 = vsel %vm1062_vm6, %v1217_v59, %v1216_v42  ;;  %v1436_v44 = vsel %vm1053_vm3, %v1435_v11, %v1434_v51  ;;  %v1329_v18 = vrot.slane %v5049_v49, 2  ;;  %v5051_v59 = vld [vmem:[#allocation84_spill] sm:$0xff] }
 0x246   : > { %v967_v4 = vpop.permute.xlu1 %966  ;;  %v1110_v13 = vsel %vm1047_vm1, %v1109_v24, %v5050_v20  ;;  %v1316_v39 = vsel %vm1062_vm6, %v1315_v10, %v1314_v28  ;;  %v1428_v48 = vsel %vm1062_vm6, %v1427_v62, %v1426_v33  ;;  %v1328_v9 = vsel %vm1059_vm5, %v1327_v27, %v1326_v52  ;;  %v5057_v33 = vld [vmem:[#allocation78_spill] sm:$0xff] }
 0x247   : > { %v1474_v31 = vsel %vm1047_vm1, %v1473_v58, %v967_v4  ;;  %v5047_v4 = vld [vmem:[#allocation46_spill] sm:$0xff]  ;;  %v1439_v11 = vrot.slane %v5051_v59, 3  ;;  %v4061_v42 = vsel %vm1065_vm7, %v1107_v0, %v1106_v23  ;;  %v4064_v51 = vsel %vm1065_vm7, %v1219_v7, %v1218_v41  ;;  %v5065_v59 = vld [vmem:[#allocation92_spill] sm:$0xff] }
 0x248   : > { %v4031_v3 = vsel %vm1050_vm2, %v1475_v16, %v1474_v31  ;;  %v1111_v16 = vrot.slane %v5046_v55, 6  ;;  %v1317_v30 = vrot.slane %v5047_v4, 1  ;;  %v1429_v31 = vrot.slane %v5048_v36, 1  ;;  %5052 = vst [vmem:[#allocation18_spill] sm:$0xff] %v4061_v42  ;;  %5053 = vst [vmem:[#allocation13_spill] sm:$0xff] %v4064_v51  ;;  %v5061_v55 = vld [vmem:[#allocation22_spill] sm:$0xff] }
 0x249   : > { %5039 = vst [vmem:[#allocation11_spill] sm:$0xff] %v4031_v3  ;;  %v4033_v12 = vpop.permute.xlu0 %972  ;;  %v1438_v56 = vsel %vm1056_vm4, %v1437_v15, %v1436_v44  ;;  %v1113_v24 = vrot.slane %v5054_v14, 5  ;;  %v4072_v28 = vsel %vm1065_vm7, %v1093_v1, %v3977_v40  ;;  %v4075_v10 = vsel %vm1065_vm7, %v1205_v54, %v1204_v61  ;;  %v5059_v15 = vld [vmem:[#allocation85_spill] sm:$0xff]  ;;  %v5060_v54 = vld [vmem:[#allocation91_spill] sm:$0xff]  ;;  %v5066_v14 = vld [vmem:[#allocation8_spill] sm:$0xff] }
 0x24a   : > { %v4043_v58 = vpop.permute.xlu1 %982  ;;  %5055 = vst [vmem:[#allocation19_spill] sm:$0xff] %v4072_v28  ;;  %5056 = vst [vmem:[#allocation25_spill] sm:$0xff] %v4075_v10  ;;  %v1331_v62 = vrot.slane %v5057_v33, 1  ;;  %v1112_v27 = vsel %vm1050_vm2, %v1111_v16, %v1110_v13  ;;  %v4080_v0 = vsel %vm1065_vm7, %v1317_v30, %v1316_v39  ;;  %v4083_v7 = vsel %vm1065_vm7, %v1429_v31, %v1428_v48  ;;  %v5063_v13 = vld [vmem:[#allocation86_spill] sm:$0xff]  ;;  %v5067_v33 = vld [vmem:[#allocation9_spill] sm:$0xff] }
 0x24b   : > { %5058 = vst [vmem:[#allocation23_spill] sm:$0xff] %v4080_v0  ;;  %v1330_v52 = vsel %vm1062_vm6, %v1329_v18, %v1328_v9  ;;  %v1441_v23 = vrot.slane %v5059_v15, 2  ;;  %v1549_v40 = vcombine.low %v3917_v34, %v4061_v42  ;;  %v1685_v1 = vcombine.low %v3925_v35, %v4064_v51  ;;  %v5082_v51 = vld [vmem:[#allocation103_spill] sm:$0xff]  ;;  %v5091_v34 = vld [vmem:[#allocation114_spill] sm:$0xff] }
 0x24c   : > { %v1440_v61 = vsel %vm1059_vm5, %v1439_v11, %v1438_v56  ;;  %v1115_v44 = vrot.slane %v5060_v54, 4  ;;  %v1415_v16 = vrot.slane %v5061_v55, 1  ;;  %v1533_v4 = vcombine.low %v3844_v43, %v4072_v28  ;;  %v5071_v55 = vld [vmem:[#allocation97_spill] sm:$0xff] }
 0x24d   : > { %v4054_v45 = vpop.permute.xlu0 %988  ;;  %v1669_v30 = vcombine.low %v3848_v38, %v4075_v10  ;;  %v1114_v36 = vsel %vm1053_vm3, %v1113_v24, %v1112_v27  ;;  %v1805_v49 = vcombine.low %v3856_v21, %v4080_v0  ;;  %v1941_v18 = vcombine.low %v3859_v6, %v4083_v7  ;;  %v5083_v21 = vld [vmem:[#allocation111_spill] sm:$0xff] }
 0x24e   : > { %v4068_v2 = vpop.permute.xlu1 %998  ;;  %v4108_v20 = vsel %vm1065_vm7, %v1331_v62, %v1330_v52  ;;  %v1443_v39 = vrot.slane %v5063_v13, 1  ;;  %v4115_v48 = vsel %vm1065_vm7, %v1303_v5, %v3937_v37  ;;  %v1442_v9 = vsel %vm1062_vm6, %v1441_v23, %v1440_v61  ;;  %v5070_v61 = vld [vmem:[#allocation93_spill] sm:$0xff] }
 0x24f   : > { %5062 = vst [vmem:[#allocation32_spill] sm:$0xff] %v4108_v20  ;;  %5064 = vst [vmem:[#allocation12_spill] sm:$0xff] %v4115_v48  ;;  %v1117_v11 = vrot.slane %v5065_v59, 3  ;;  %v4124_v24 = vsub.s32 %v1601_v32, %v5066_v14  ;;  %v4127_v62 = vrot.slane %v1549_v40, %v5067_v33  ;;  %v4130_v27 = vrot.slane %v1685_v1, %v5067_v33 }
 0x250   : > { %v1116_v37 = vsel %vm1056_vm4, %v1115_v44, %v1114_v36  ;;  %v1221_v5 = vrot.slane %v5068_v46, 7  ;;  %v4136_v52 = vsel %vm1065_vm7, %v1415_v16, %v3950_v17  ;;  %v4139_v15 = vrot.slane %v1533_v4, %v5067_v33  ;;  %v5072_v4 = vld [vmem:[#allocation104_spill] sm:$0xff] }
 0x251   : > { %v4087_v41 = vpop.permute.xlu0 %1004  ;;  %5069 = vst [vmem:[#allocation14_spill] sm:$0xff] %v4136_v52  ;;  %v4142_v63 = vrot.slane %v1669_v30, %v5067_v33  ;;  %v1821_v32 = vcombine.low %v4115_v48, %v4108_v20  ;;  %v4149_v40 = vrot.slane %v1805_v49, %v5067_v33  ;;  %v4152_v1 = vrot.slane %v1941_v18, %v5067_v33  ;;  %v5073_v36 = vld [vmem:[#allocation112_spill] sm:$0xff]  ;;  %v5074_v49 = vld [vmem:[#allocation95_spill] sm:$0xff] }
 0x252   : > { %v4101_v31 = vpop.permute.xlu1 %1014  ;;  %v4155_v17 = vsel %vm1065_vm7, %v1443_v39, %v1442_v9  ;;  %v1119_v54 = vrot.slane %v5070_v61, 2  ;;  %v1118_v44 = vsel %vm1059_vm5, %v1117_v11, %v1116_v37  ;;  %v1223_v16 = vrot.slane %v5071_v55, 6  ;;  %v5075_v18 = vld [vmem:[#allocation120_spill] sm:$0xff]  ;;  %v5080_v39 = vld [vmem:[#allocation105_spill] sm:$0xff]  ;;  %v5087_v20 = vld [vmem:[#allocation119_spill] sm:$0xff] }
 0x253   : > { %v1333_v30 = vrot.slane %v5072_v4, 7  ;;  %v1445_v13 = vrot.slane %v5073_v36, 7  ;;  %v1222_v46 = vsel %vm1047_vm1, %v1221_v5, %v5074_v49  ;;  %v1123_v14 = vrot.slane %v5075_v18, 7  ;;  %v5076_v61 = vld [vmem:[#allocation128_spill] sm:$0xff]  ;;  %v5079_v49 = vld [vmem:[#allocation98_spill] sm:$0xff]  ;;  %v5081_v9 = vld [vmem:[#allocation113_spill] sm:$0xff] }
 0x254   : > { %v4172_v11 = vrot.slane %v1821_v32, %v5067_v33  ;;  %v1235_v55 = vrot.slane %v5076_v61, 7  ;;  %v5077_v4 = vld [vmem:[#allocation136_spill] sm:$0xff]  ;;  %v4181_v5 = vsel %vm1062_vm6, %v1119_v54, %v1118_v44  ;;  %v1225_v18 = vrot.slane %v5079_v49, 5  ;;  %v5086_v54 = vld [vmem:[#allocation99_spill] sm:$0xff] }
 0x255   : > { %v4119_v56 = vpop.permute.xlu0 %1020  ;;  %v1347_v36 = vrot.slane %v5077_v4, 7  ;;  %v1335_v10 = vrot.slane %v5080_v39, 6  ;;  %v1447_v35 = vrot.slane %v5081_v9, 6  ;;  %v1224_v32 = vsel %vm1050_vm2, %v1223_v16, %v1222_v46  ;;  %v5084_v4 = vld [vmem:[#allocation121_spill] sm:$0xff]  ;;  %v5090_v16 = vld [vmem:[#allocation106_spill] sm:$0xff] }
 0x256   : > { %v4146_v23 = vpop.permute.xlu1 %1030  ;;  %v1334_v37 = vsel %vm1047_vm1, %v1333_v30, %v5082_v51  ;;  %v1446_v61 = vsel %vm1047_vm1, %v1445_v13, %v5083_v21  ;;  %v1125_v0 = vrot.slane %v5084_v4, 6  ;;  %v1227_v44 = vrot.slane %v5086_v54, 4  ;;  %v5088_v39 = vld [vmem:[#allocation129_spill] sm:$0xff]  ;;  %v5092_v30 = vld [vmem:[#allocation127_spill] sm:$0xff] }
 0x257   : > { %v1124_v49 = vsel %vm1047_vm1, %v1123_v14, %v5087_v20  ;;  %v1237_v43 = vrot.slane %v5088_v39, 6  ;;  %v5089_v9 = vld [vmem:[#allocation137_spill] sm:$0xff]  ;;  %v1337_v46 = vrot.slane %v5090_v16, 5  ;;  %v1449_v51 = vrot.slane %v5091_v34, 5  ;;  %v5093_v13 = vld [vmem:[#allocation135_spill] sm:$0xff]  ;;  %v5095_v39 = vld [vmem:[#allocation122_spill] sm:$0xff] }
 0x258   : > { %v1349_v28 = vrot.slane %v5089_v9, 6  ;;  %v1236_v21 = vsel %vm1047_vm1, %v1235_v55, %v5092_v30  ;;  %v1348_v4 = vsel %vm1047_vm1, %v1347_v36, %v5093_v13  ;;  %v1226_v54 = vsel %vm1053_vm3, %v1225_v18, %v1224_v32  ;;  %v5098_v55 = vld [vmem:[#allocation138_spill] sm:$0xff]  ;;  %v5100_v36 = vld [vmem:[#allocation107_spill] sm:$0xff] }
 0x259   : > { %v4162_v59 = vpop.permute.xlu0 %1036  ;;  %v1336_v20 = vsel %vm1050_vm2, %v1335_v10, %v1334_v37  ;;  %v1448_v14 = vsel %vm1050_vm2, %v1447_v35, %v1446_v61  ;;  %v1127_v9 = vrot.slane %v5095_v39, 5  ;;  %v1229_v16 = vrot.slane %v5096_v29, 3  ;;  %v5102_v32 = vld [vmem:[#allocation123_spill] sm:$0xff] }
 0x25a   : > { %v4178_v38 = vpop.permute.xlu1 %974  ;;  %v1126_v34 = vsel %vm1050_vm2, %v1125_v0, %v1124_v49  ;;  %v1351_v30 = vrot.slane %v5098_v55, 5  ;;  %v1339_v13 = vrot.slane %v5100_v36, 4  ;;  %v1238_v10 = vsel %vm1050_vm2, %v1237_v43, %v1236_v21  ;;  %v5104_v49 = vld [vmem:[#allocation94_spill] sm:$0xff]  ;;  %v5105_v36 = vld [vmem:[#allocation131_spill] sm:$0xff]  ;;  %v5107_v21 = vld [vmem:[#allocation108_spill] sm:$0xff] }
 0x25b   : > { %5078 = vst [vmem:[#allocation26_spill] sm:$0xff] %v4178_v38  ;;  %v1350_v35 = vsel %vm1050_vm2, %v1349_v28, %v1348_v4  ;;  %v1228_v37 = vsel %vm1056_vm4, %v1227_v44, %v1226_v54  ;;  %v1338_v29 = vsel %vm1053_vm3, %v1337_v46, %v1336_v20  ;;  %v1450_v0 = vsel %vm1053_vm3, %v1449_v51, %v1448_v14  ;;  %v5108_v4 = vld [vmem:[#allocation116_spill] sm:$0xff] }
 0x25c   : > { %v1121_v39 = vrot.slane %v5104_v49, 1  ;;  %v1128_v55 = vsel %vm1053_vm3, %v1127_v9, %v1126_v34  ;;  %v1341_v28 = vrot.slane %v5107_v21, 3  ;;  %v1453_v44 = vrot.slane %v5108_v4, 3  ;;  %v5110_v34 = vld [vmem:[#allocation124_spill] sm:$0xff]  ;;  %v5111_v49 = vld [vmem:[#allocation101_spill] sm:$0xff] }
 0x25d   : > { %v4192_v48 = vpop.permute.xlu0 %990  ;;  %v1352_v51 = vsel %vm1053_vm3, %v1351_v30, %v1350_v35  ;;  %v1230_v20 = vsel %vm1059_vm5, %v1229_v16, %v1228_v37  ;;  %v1340_v14 = vsel %vm1056_vm4, %v1339_v13, %v1338_v29  ;;  %v5112_v21 = vld [vmem:[#allocation132_spill] sm:$0xff]  ;;  %v5114_v30 = vld [vmem:[#allocation109_spill] sm:$0xff]  ;;  %v5116_v37 = vcombine.low %v4136_v52, %v4155_v17  ;;  %v5125_v52 = vld [vmem:[#allocation142_spill] sm:$0xff] }
 0x25e   : > { %5085 = vst [vmem:[#allocation15_spill] sm:$0xff] %v4192_v48  ;;  %v4205_v42 = vpop.permute.xlu1 %1006  ;;  %v5097_v48 = vld [vmem:[#allocation130_spill] sm:$0xff]  ;;  %v1243_v4 = vrot.slane %v5112_v21, 3  ;;  %v1343_v35 = vrot.slane %v5114_v30, 2 }
 0x25f   : > { %5094 = vst [vmem:[#allocation20_spill] sm:$0xff] %v4205_v42  ;;  %v1239_v38 = vrot.slane %v5097_v48, 5  ;;  %v5101_v42 = vld [vmem:[#allocation115_spill] sm:$0xff]  ;;  %v1129_v48 = vrot.slane %v5102_v32, 4  ;;  %v1131_v32 = vrot.slane %v5110_v34, 3  ;;  %v4255_v29 = vrot.slane %v5116_v37, %v5067_v33  ;;  %v5120_v30 = vld [vmem:[#allocation102_spill] sm:$0xff] }
 0x260   : > { %v1451_v18 = vrot.slane %v5101_v42, 4  ;;  %v1241_v42 = vrot.slane %v5105_v36, 4  ;;  %v1233_v37 = vrot.slane %v5120_v30, 1 }
 0x261   : > { %v4215_v3 = vpop.permute.xlu0 %1022  ;;  %v1240_v46 = vsel %vm1053_vm3, %v1239_v38, %v1238_v10  ;;  %v1130_v36 = vsel %vm1056_vm4, %v1129_v48, %v1128_v55 }
 0x262   : > { %5099 = vst [vmem:[#allocation33_spill] sm:$0xff] %v4215_v3  ;;  %v4225_v61 = vpop.permute.xlu1 %1038  ;;  %v5106_v3 = vld [vmem:[#allocation139_spill] sm:$0xff]  ;;  %v1452_v9 = vsel %vm1056_vm4, %v1451_v18, %v1450_v0  ;;  %v1242_v13 = vsel %vm1056_vm4, %v1241_v42, %v1240_v46  ;;  %v1342_v0 = vsel %vm1059_vm5, %v1341_v28, %v1340_v14  ;;  %v1132_v42 = vsel %vm1059_vm5, %v1131_v32, %v1130_v36  ;;  %v5122_v32 = vld [vmem:[#allocation118_spill] sm:$0xff] }
 0x263   : > { %5103 = vst [vmem:[#allocation31_spill] sm:$0xff] %v4225_v61  ;;  %v1353_v43 = vrot.slane %v5106_v3, 4  ;;  %v1231_v3 = vrot.slane %v5111_v49, 2  ;;  %v5113_v61 = vld [vmem:[#allocation140_spill] sm:$0xff]  ;;  %v1454_v48 = vsel %vm1059_vm5, %v1453_v44, %v1452_v9  ;;  %v1244_v28 = vsel %vm1059_vm5, %v1243_v4, %v1242_v13 }
 0x264   : > { %v1355_v38 = vrot.slane %v5113_v61, 3  ;;  %v5117_v61 = vld [vmem:[#allocation125_spill] sm:$0xff]  ;;  %v1344_v9 = vsel %vm1062_vm6, %v1343_v35, %v1342_v0  ;;  %v1457_v36 = vrot.slane %v5122_v32, 1  ;;  %v1359_v4 = vrot.slane %v5125_v52, 1 }
 0x265   : > { %v4235_v54 = vpop.permute.xlu0 %976  ;;  %v1354_v18 = vsel %vm1056_vm4, %v1353_v43, %v1352_v51  ;;  %v1133_v55 = vrot.slane %v5117_v61, 2  ;;  %v5118_v43 = vld [vmem:[#allocation133_spill] sm:$0xff]  ;;  %v1232_v21 = vsel %vm1062_vm6, %v1231_v3, %v1230_v20  ;;  %v5121_v61 = vld [vmem:[#allocation110_spill] sm:$0xff] }
 0x266   : > { %5109 = vst [vmem:[#allocation40_spill] sm:$0xff] %v4235_v54  ;;  %v4245_v10 = vpop.permute.xlu1 %992  ;;  %v5115_v54 = vld [vmem:[#allocation117_spill] sm:$0xff]  ;;  %v1245_v46 = vrot.slane %v5118_v43, 2  ;;  %v1356_v44 = vsel %vm1059_vm5, %v1355_v38, %v1354_v18  ;;  %v5124_v3 = vld [vmem:[#allocation134_spill] sm:$0xff] }
 0x267   : > { %v1455_v16 = vrot.slane %v5115_v54, 2  ;;  %v1122_v54 = vsel %vm1065_vm7, %v1121_v39, %v4181_v5  ;;  %v5119_v51 = vld [vmem:[#allocation141_spill] sm:$0xff]  ;;  %v1345_v5 = vrot.slane %v5121_v61, 1  ;;  %v1134_v43 = vsel %vm1062_vm6, %v1133_v55, %v1132_v42 }
 0x268   : > { %v1357_v49 = vrot.slane %v5119_v51, 2  ;;  %v5123_v51 = vld [vmem:[#allocation126_spill] sm:$0xff]  ;;  %v1247_v30 = vrot.slane %v5124_v3, 1  ;;  %v1246_v38 = vsel %vm1062_vm6, %v1245_v46, %v1244_v28  ;;  %v1565_v18 = vcombine.low %v1122_v54, %v3792_v60 }
 0x269   : > { %v4260_v34 = vpop.permute.xlu0 %1008  ;;  %v1456_v39 = vsel %vm1062_vm6, %v1455_v16, %v1454_v48  ;;  %v1135_v20 = vrot.slane %v5123_v51, 1  ;;  %v1566_v16 = vcombine.high %v1122_v54, %v3792_v60  ;;  %v5126_v55 = vcombine.low %v4139_v15, %v4127_v62 }
 0x26a   : > { %v4271_v14 = vpop.permute.xlu1 %1024  ;;  %v1358_v35 = vsel %vm1062_vm6, %v1357_v49, %v1356_v44  ;;  %v5127_v42 = vcombine.low %v4142_v63, %v4130_v27  ;;  %v1598_v60 = vcombine.high %v4139_v15, %v4127_v62  ;;  %v4306_v54 = vsel %vm1065_vm7, %v1233_v37, %v1232_v21 }
 0x26b   : > { %v4295_v52 = vrot.slane %v5126_v55, %v4124_v24  ;;  %v4309_v49 = vsel %vm1065_vm7, %v1345_v5, %v1344_v9  ;;  %v1869_v28 = vcombine.low %v4149_v40, %v4172_v11  ;;  %v2005_v44 = vcombine.low %v4152_v1, %v4255_v29 }
 0x26c   : > { %v4301_v46 = vrot.slane %v5127_v42, %v4124_v24  ;;  %v4316_v61 = vsel %vm1065_vm7, %v1457_v36, %v1456_v39  ;;  %v4319_v32 = vsel %vm1065_vm7, %v1135_v20, %v1134_v43  ;;  %v4322_v51 = vsel %vm1065_vm7, %v1247_v30, %v1246_v38  ;;  %v5129_v42 = vld [vmem:[#allocation26_spill] sm:$0xff] }
 0x26d   : > { %v4281_v13 = vpop.permute.xlu0 %1040  ;;  %v4325_v21 = vsel %vm1065_vm7, %v1359_v4, %v1358_v35  ;;  %v4330_v9 = vrot.slane %v1565_v18, %v5067_v33  ;;  %v4333_v5 = vrot.slane %v1566_v16, %v5067_v33  ;;  %v1151_v39 = vrot.slane %v3921_v8, 7 }
 0x26e   : > { %v4289_v48 = vpop.permute.xlu1 %978  ;;  %v1263_v36 = vrot.slane %v3934_v47, 7  ;;  %v1701_v43 = vcombine.low %v4306_v54, %v3851_v26  ;;  %v1375_v20 = vrot.slane %v3947_v57, 7  ;;  %v1487_v3 = vrot.slane %v3960_v50, 7 }
 0x26f   : > { %v1477_v30 = vrot.slane %v4033_v12, 5  ;;  %v1152_v38 = vsel %vm1047_vm1, %v1151_v39, %v4043_v58  ;;  %v1155_v35 = vrot.slane %v4054_v45, 5  ;;  %v1267_v47 = vrot.slane %v4087_v41, 5  ;;  %v5128_v41 = vld [vmem:[#allocation11_spill] sm:$0xff] }
 0x270   : > { %v1264_v8 = vsel %vm1047_vm1, %v1263_v36, %v4068_v2  ;;  %v1153_v18 = vrot.slane %v3982_v22, 6  ;;  %v1265_v16 = vrot.slane %v3992_v25, 6  ;;  %v1377_v57 = vrot.slane %v4003_v19, 6  ;;  %v5130_v36 = vld [vmem:[#allocation15_spill] sm:$0xff] }
 0x271   : > { %v4327_v37 = vpop.permute.xlu0 %994  ;;  %v1489_v50 = vrot.slane %v4013_v53, 6  ;;  %v1376_v55 = vsel %vm1047_vm1, %v1375_v20, %v4101_v31  ;;  %v1379_v58 = vrot.slane %v4119_v56, 5  ;;  %v1488_v45 = vsel %vm1047_vm1, %v1487_v3, %v4146_v23  ;;  %v5131_v23 = vld [vmem:[#allocation20_spill] sm:$0xff] }
 0x272   : > { %v1011_v4 = vpop.permute.xlu1 %1010  ;;  %v1491_v2 = vrot.slane %v4162_v59, 5  ;;  %v1478_v22 = vsel %vm1053_vm3, %v1477_v30, %v5128_v41  ;;  %v1154_v25 = vsel %vm1050_vm2, %v1153_v18, %v1152_v38  ;;  %v1266_v19 = vsel %vm1050_vm2, %v1265_v16, %v1264_v8  ;;  %v5132_v41 = vld [vmem:[#allocation33_spill] sm:$0xff]  ;;  %v5133_v18 = vld [vmem:[#allocation40_spill] sm:$0xff] }
 0x273   : > { %v1479_v53 = vrot.slane %v5129_v42, 4  ;;  %v1156_v31 = vsel %vm1053_vm3, %v1155_v35, %v1154_v25  ;;  %v1268_v56 = vsel %vm1053_vm3, %v1267_v47, %v1266_v19  ;;  %v1157_v20 = vrot.slane %v5130_v36, 4 }
 0x274   : > { %v1269_v3 = vrot.slane %v5131_v23, 4  ;;  %v1378_v59 = vsel %vm1050_vm2, %v1377_v57, %v1376_v55  ;;  %v1490_v30 = vsel %vm1050_vm2, %v1489_v50, %v1488_v45  ;;  %v1381_v38 = vrot.slane %v5132_v41, 4 }
 0x275   : > { %v1027_v12 = vpop.permute.xlu0 %1026  ;;  %v1481_v8 = vrot.slane %v5133_v18, 3  ;;  %v1380_v42 = vsel %vm1053_vm3, %v1379_v58, %v1378_v59  ;;  %v1492_v0 = vsel %vm1053_vm3, %v1491_v2, %v1490_v30  ;;  %v1159_v35 = vrot.slane %v4245_v10, 3  ;;  %v5134_v10 = vld [vmem:[#allocation31_spill] sm:$0xff] }
 0x276   : > { %v4363_v39 = vpop.permute.xlu1 %1042  ;;  %v1271_v47 = vrot.slane %v4260_v34, 3  ;;  %v1480_v25 = vsel %vm1056_vm4, %v1479_v53, %v1478_v22  ;;  %v1383_v19 = vrot.slane %v4271_v14, 3  ;;  %v1483_v57 = vrot.slane %v4289_v48, 2 }
 0x277   : > { %v1161_v50 = vrot.slane %v4327_v37, 2  ;;  %v1158_v45 = vsel %vm1056_vm4, %v1157_v20, %v1156_v31  ;;  %v1270_v36 = vsel %vm1056_vm4, %v1269_v3, %v1268_v56  ;;  %v1273_v58 = vrot.slane %v1011_v4, 2 }
 0x278   : > { %v1382_v2 = vsel %vm1056_vm4, %v1381_v38, %v1380_v42  ;;  %v1493_v59 = vrot.slane %v5134_v10, 4  ;;  %v1482_v34 = vsel %vm1059_vm5, %v1481_v8, %v1480_v25  ;;  %v1160_v14 = vsel %vm1059_vm5, %v1159_v35, %v1158_v45  ;;  %v5135_v38 = vld [vmem:[#allocation17_spill] sm:$0xff] }
 0x279   : > { %v965_v16 = vpop.permute.xlu0 %964  ;;  %v1272_v48 = vsel %vm1059_vm5, %v1271_v47, %v1270_v36  ;;  %v1385_v37 = vrot.slane %v1027_v12, 2  ;;  %v1384_v31 = vsel %vm1059_vm5, %v1383_v19, %v1382_v2  ;;  %v1495_v56 = vrot.slane %v4281_v13, 3 }
 0x27a   : > { %v981_v55 = vpop.permute.xlu1 %980  ;;  %v1373_v23 = vrot.slane %v965_v16, 1  ;;  %v1484_v4 = vsel %vm1062_vm6, %v1483_v57, %v1482_v34  ;;  %v1162_v20 = vsel %vm1062_vm6, %v1161_v50, %v1160_v14  ;;  %v1274_v41 = vsel %vm1062_vm6, %v1273_v58, %v1272_v48 }
 0x27b   : > { %v1485_v22 = vrot.slane %v981_v55, 1  ;;  %v1497_v12 = vrot.slane %v4363_v39, 2  ;;  %v1494_v25 = vsel %vm1056_vm4, %v1493_v59, %v1492_v0  ;;  %v1386_v19 = vsel %vm1062_vm6, %v1385_v37, %v1384_v31  ;;  %v5136_v31 = vld [vmem:[#allocation143_spill] sm:$0xff] }
 0x27c   : > { %v1374_v18 = vsel %vm1065_vm7, %v1373_v23, %v5135_v38  ;;  %v4419_v10 = vrot.slane %v1701_v43, %v5067_v33 }
 0x27d   : > { %v997_v53 = vpop.permute.xlu0 %996  ;;  %v4398_v42 = vsel %vm1065_vm7, %v1485_v22, %v1484_v4  ;;  %v1837_v55 = vcombine.low %v4309_v49, %v1374_v18 }
 0x27e   : > { %v1163_v30 = vrot.slane %v997_v53, 1  ;;  %v1013_v3 = vpop.permute.xlu1 %1012  ;;  %v1973_v0 = vcombine.low %v4316_v61, %v4398_v42 }
 0x27f   : > { %v1275_v16 = vrot.slane %v1013_v3, 1 }
 0x280   : > { %v1164_v8 = vsel %vm1065_vm7, %v1163_v30, %v1162_v20  ;;  %v1845_v30 = vrot.slane %v1837_v55, %v5067_v33  ;;  %v4436_v20 = vrot.slane %v1973_v0, %v5067_v33  ;;  %v1974_v0 = vcombine.high %v4316_v61, %v4398_v42 }
 0x281   : > { %v1581_v13 = vcombine.low %v4319_v32, %v1164_v8  ;;  %v1582_v35 = vcombine.high %v4319_v32, %v1164_v8  ;;  %v1029_v47 = vpop.permute.xlu0 %1028  ;;  %v1276_v57 = vsel %vm1065_vm7, %v1275_v16, %v1274_v41  ;;  %v1496_v32 = vsel %vm1059_vm5, %v1495_v56, %v1494_v25 }
 0x282   : > { %v1387_v50 = vrot.slane %v1029_v47, 1  ;;  %v1717_v36 = vcombine.low %v4322_v51, %v1276_v57  ;;  %v1045_v58 = vpop.permute.xlu1 %1044  ;;  %v1498_v59 = vsel %vm1062_vm6, %v1497_v12, %v1496_v32 }
 0x283   : > { %v1589_v39 = vrot.slane %v1581_v13, %v5067_v33  ;;  %v4408_v45 = vrot.slane %v1582_v35, %v5067_v33  ;;  %v1499_v2 = vrot.slane %v1045_v58, 1  ;;  %v1838_v13 = vcombine.high %v4309_v49, %v1374_v18 }
 0x284   : > { %v1388_v23 = vsel %vm1065_vm7, %v1387_v50, %v1386_v19  ;;  %v4423_v34 = vrot.slane %v1717_v36, %v5067_v33  ;;  %v1718_v19 = vcombine.high %v4322_v51, %v1276_v57  ;;  %v1702_v49 = vcombine.high %v4306_v54, %v3851_v26  ;;  %v5137_v36 = vld [vmem:[#allocation14_spill] sm:$0xff] }
 0x285   : > { %v1853_v22 = vcombine.low %v4325_v21, %v1388_v23  ;;  %v1500_v53 = vsel %vm1065_vm7, %v1499_v2, %v1498_v59  ;;  %v1629_v14 = vcombine.low %v4330_v9, %v1589_v39  ;;  %v1630_v48 = vcombine.high %v4330_v9, %v1589_v39 }
 0x286   : > { %v1645_v37 = vcombine.low %v4333_v5, %v4408_v45  ;;  %v1989_v56 = vcombine.low %v5136_v31, %v1500_v53  ;;  %v1990_v4 = vcombine.high %v5136_v31, %v1500_v53  ;;  %v1765_v41 = vcombine.low %v4419_v10, %v4423_v34  ;;  %v5139_v31 = vld [vmem:[#allocation18_spill] sm:$0xff] }
 0x287   : > { %v1861_v43 = vrot.slane %v1853_v22, %v5067_v33  ;;  %v1637_v3 = vrot.slane %v1629_v14, %v4124_v24  ;;  %v1766_v9 = vcombine.high %v4419_v10, %v4423_v34  ;;  %v1854_v38 = vcombine.high %v4325_v21, %v1388_v23 }
 0x288   : > { %v4445_v8 = vrot.slane %v1989_v56, %v5067_v33  ;;  %v1773_v25 = vrot.slane %v1765_v41, %v4124_v24  ;;  %v1877_v21 = vrot.slane %v1869_v28, %v4124_v24  ;;  %v1958_v58 = vcombine.high %v5137_v36, %v4155_v17  ;;  %v5140_v56 = vld [vmem:[#allocation24_spill] sm:$0xff] }
 0x289   : > { %v1901_v16 = vcombine.low %v1845_v30, %v1861_v43  ;;  %v1902_v12 = vcombine.high %v1845_v30, %v1861_v43  ;;  %v1662_v35 = vcombine.high %v4295_v52, %v1637_v3  ;;  %v1661_v47 = vcombine.low %v4295_v52, %v1637_v3  ;;  %v5141_v3 = vld [vmem:[#allocation19_spill] sm:$0xff]  ;;  %v5142_v41 = vld [vmem:[#allocation144_spill] sm:$0xff] }
 0x28a   : > { %v2037_v55 = vcombine.low %v4436_v20, %v4445_v8  ;;  %v1797_v39 = vcombine.low %v4301_v46, %v1773_v25  ;;  %v4465_v51 = vrot.slane %v1854_v38, %v5067_v33  ;;  %v4471_v32 = vrot.slane %v1838_v13, %v5067_v33 }
 0x28b   : > { %v1909_v50 = vrot.slane %v1901_v16, %v4124_v24  ;;  %v2081_v18 = vsel %vm2077_vm8, %v1662_v35, -inf  ;;  %v2078_v52 = vsel %vm2077_vm8, %v1661_v47, -inf  ;;  %v2013_v26 = vrot.slane %v2005_v44, %v4124_v24 }
 0x28c   : > { %2082 = vmax.xlane.f32.xlu1 %v2081_v18  ;;  %2079 = vmax.xlane.f32.xlu0 %v2078_v52  ;;  %v2045_v57 = vrot.slane %v2037_v55, %v4124_v24  ;;  %v4481_v54 = vrot.slane %v1598_v60, %v4124_v24  ;;  %v4486_v23 = vrot.slane %v1718_v19, %v5067_v33  ;;  %v2102_v10 = vsel %vm2077_vm8, %v1797_v39, -inf  ;;  %v5143_v55 = vld [vmem:[#allocation32_spill] sm:$0xff]  ;;  %v5145_v39 = vld [vmem:[#allocation23_spill] sm:$0xff] }
 0x28d   : > { %v1933_v28 = vcombine.low %v1877_v21, %v1909_v50  ;;  %v1644_v2 = vrot.slane %v1630_v48, %v4124_v24  ;;  %v1798_v44 = vcombine.high %v4301_v46, %v1773_v25  ;;  %v2038_v62 = vcombine.high %v4436_v20, %v4445_v8 }
 0x28e   : > { %v2069_v59 = vcombine.low %v2013_v26, %v2045_v57  ;;  %v4495_v15 = vrot.slane %v1702_v49, %v5067_v33  ;;  %v1870_v60 = vcombine.high %v4149_v40, %v4172_v11  ;;  %v1917_v61 = vcombine.low %v4471_v32, %v4465_v51  ;;  %v5144_v49 = vld [vmem:[#allocation12_spill] sm:$0xff] }
 0x28f   : > { %v2126_v17 = vsel %vm2077_vm8, %v1933_v28, -inf  ;;  %v4502_v42 = vrot.slane %v1958_v58, %v5067_v33  ;;  %v4505_v34 = vrot.slane %v1990_v4, %v5067_v33  ;;  %v1663_v46 = vcombine.low %v4481_v54, %v1644_v2  ;;  %v5146_v28 = vld [vmem:[#allocation146_spill] sm:$0xff] }
 0x290   : > { %2127 = vmax.xlane.f32.xlu1 %v2126_v17  ;;  %2103 = vmax.xlane.f32.xlu0 %v2102_v10  ;;  %v1934_v22 = vcombine.high %v1877_v21, %v1909_v50  ;;  %v1916_v53 = vrot.slane %v1902_v12, %v4124_v24  ;;  %v1781_v14 = vcombine.low %v4495_v15, %v4486_v23  ;;  %v2150_v30 = vsel %vm2077_vm8, %v2069_v59, -inf }
 0x291   : > { %v5138_v40 = vcombine.high %v3859_v6, %v4083_v7  ;;  %v4518_v48 = vrot.slane %v1974_v0, %v5067_v33  ;;  %v2105_v43 = vsel %vm2077_vm8, %v1798_v44, -inf  ;;  %v1550_v4 = vcombine.high %v5140_v56, %v5139_v31 }
 0x292   : > { %v1884_v20 = vrot.slane %v1870_v60, %v4124_v24  ;;  %v1534_v38 = vcombine.high %v5142_v41, %v5141_v3  ;;  %v1734_v6 = vcombine.high %v4142_v63, %v4130_v27  ;;  %v2084_v16 = vsel %vm2077_vm8, %v1663_v46, -inf }
 0x293   : > { %v4515_v11 = vrot.slane %v5138_v40, %v5067_v33  ;;  %v2053_v7 = vcombine.low %v4518_v48, %v4505_v34  ;;  %v2129_v12 = vsel %vm2077_vm8, %v1934_v22, -inf  ;;  %v1646_v35 = vcombine.high %v4333_v5, %v4408_v45  ;;  %v5149_v22 = vld [vmem:[#allocation25_spill] sm:$0xff] }
 0x294   : > { %2151 = vmax.xlane.f32.xlu1 %v2150_v30  ;;  %2106 = vmax.xlane.f32.xlu0 %v2105_v43  ;;  %v1935_v13 = vcombine.low %v1884_v20, %v1916_v53  ;;  %v2070_v47 = vcombine.high %v2013_v26, %v2045_v57  ;;  %v1780_v25 = vrot.slane %v1766_v9, %v4124_v24  ;;  %v5150_v40 = vld [vmem:[#allocation145_spill] sm:$0xff] }
 0x295   : > { %v2022_v8 = vcombine.high %v4515_v11, %v4502_v42  ;;  %v1918_v27 = vcombine.high %v4471_v32, %v4465_v51  ;;  %v1782_v63 = vcombine.high %v4495_v15, %v4486_v23  ;;  %v4543_v19 = vrot.slane %v1550_v4, %v5067_v33 }
 0x296   : > { %v2054_v21 = vcombine.high %v4518_v48, %v4505_v34  ;;  %v4548_v50 = vrot.slane %v1534_v38, %v5067_v33  ;;  %v1822_v9 = vcombine.high %v5144_v49, %v5143_v55  ;;  %v1748_v18 = vrot.slane %v1734_v6, %v4124_v24 }
 0x297   : > { %v2006_v52 = vcombine.high %v4152_v1, %v4255_v29  ;;  %v1806_v57 = vcombine.high %v5146_v28, %v5145_v39  ;;  %v1664_v36 = vcombine.high %v4481_v54, %v1644_v2  ;;  %v4559_v58 = vrot.slane %v2022_v8, %v4124_v24  ;;  %v5147_v29 = vld [vmem:[#allocation13_spill] sm:$0xff]  ;;  %v5148_v54 = vld [vmem:[#allocation10_spill] sm:$0xff] }
 0x298   : > { %2085 = vmax.xlane.f32.xlu1 %v2084_v16  ;;  %2130 = vmax.xlane.f32.xlu0 %v2129_v12  ;;  %v4562_v26 = vrot.slane %v2054_v21, %v4124_v24  ;;  %v2132_v0 = vsel %vm2077_vm8, %v1935_v13, -inf  ;;  %v2153_v17 = vsel %vm2077_vm8, %v2070_v47, -inf  ;;  %v1799_v10 = vcombine.low %v1748_v18, %v1780_v25 }
 0x299   : > { %v2052_v59 = vrot.slane %v2038_v62, %v4124_v24  ;;  %v1613_v1 = vcombine.low %v4548_v50, %v4543_v19  ;;  %v1686_v2 = vcombine.high %v5148_v54, %v5147_v29  ;;  %v1836_v44 = vrot.slane %v1822_v9, %v5067_v33 }
 0x29a   : > { %v2020_v60 = vrot.slane %v2006_v52, %v4124_v24  ;;  %v2076_v46 = vcombine.high %v4559_v58, %v4562_v26  ;;  %v1670_v30 = vcombine.high %v5150_v40, %v5149_v22  ;;  %v1820_v62 = vrot.slane %v1806_v57, %v5067_v33 }
 0x29b   : > { %v2087_v43 = vsel %vm2077_vm8, %v1664_v36, -inf  ;;  %v1936_v31 = vcombine.high %v1884_v20, %v1916_v53  ;;  %v2108_v56 = vsel %vm2077_vm8, %v1799_v10, -inf  ;;  %v1653_v3 = vrot.slane %v1645_v37, %v4124_v24 }
 0x29c   : > { %2133 = vmax.xlane.f32.xlu1 %v2132_v0  ;;  %2154 = vmax.xlane.f32.xlu0 %v2153_v17  ;;  %v2071_v4 = vcombine.low %v2020_v60, %v2052_v59  ;;  %v4585_v41 = vsel %vm2077_vm8, %v2076_v46, -inf  ;;  %v1700_v38 = vrot.slane %v1686_v2, %v5067_v33  ;;  %v1621_v6 = vrot.slane %v1613_v1, %v4124_v24 }
 0x29d   : > { %v1885_v8 = vcombine.low %v1820_v62, %v1836_v44  ;;  %v1684_v53 = vrot.slane %v1670_v30, %v5067_v33  ;;  %v1800_v20 = vcombine.high %v1748_v18, %v1780_v25  ;;  %v2135_v16 = vsel %vm2077_vm8, %v1936_v31, -inf }
 0x29e   : > { %v2156_v12 = vsel %vm2077_vm8, %v2071_v4, -inf  ;;  %v1665_v13 = vcombine.low %v1621_v6, %v1653_v3  ;;  %v1925_v37 = vrot.slane %v1917_v61, %v4124_v24  ;;  %v2072_v49 = vcombine.high %v2020_v60, %v2052_v59 }
 0x29f   : > { %v1893_v47 = vrot.slane %v1885_v8, %v4124_v24  ;;  %v1749_v21 = vcombine.low %v1684_v53, %v1700_v38  ;;  %v2111_v55 = vsel %vm2077_vm8, %v1800_v20, -inf  ;;  %v1789_v9 = vrot.slane %v1781_v14, %v4124_v24 }
 0x2a0   : > { %2088 = vmax.xlane.f32.xlu1 %v2087_v43  ;;  %2109 = vmax.xlane.f32.xlu0 %v2108_v56  ;;  %v2090_v33 = vsel %vm2077_vm8, %v1665_v13, -inf  ;;  %v2021_v18 = vcombine.low %v4515_v11, %v4502_v42  ;;  %v1666_v52 = vcombine.high %v1621_v6, %v1653_v3  ;;  %v2159_v28 = vsel %vm2077_vm8, %v2072_v49, -inf }
 0x2a1   : > { %v1937_v25 = vcombine.low %v1893_v47, %v1925_v37  ;;  %v1757_v61 = vrot.slane %v1749_v21, %v4124_v24  ;;  %v2061_v36 = vrot.slane %v2053_v7, %v4124_v24  ;;  %v1614_v0 = vcombine.high %v4548_v50, %v4543_v19 }
 0x2a2   : > { %v2029_v14 = vrot.slane %v2021_v18, %v4124_v24  ;;  %v2093_v42 = vsel %vm2077_vm8, %v1666_v52, -inf  ;;  %v1938_v17 = vcombine.high %v1893_v47, %v1925_v37  ;;  %v1660_v59 = vrot.slane %v1646_v35, %v4124_v24  ;;  %v5152_v18 = vld [vmem:[#allocation8_spill] sm:$0xff] }
 0x2a3   : > { %v2138_v39 = vsel %vm2077_vm8, %v1937_v25, -inf  ;;  %v1801_v57 = vcombine.low %v1757_v61, %v1789_v9  ;;  %v1628_v34 = vrot.slane %v1614_v0, %v4124_v24  ;;  %v1886_v48 = vcombine.high %v1820_v62, %v1836_v44 }
 0x2a4   : > { %2136 = vmax.xlane.f32.xlu1 %v2135_v16  ;;  %2157 = vmax.xlane.f32.xlu0 %v2156_v12  ;;  %v2073_v10 = vcombine.low %v2029_v14, %v2061_v36  ;;  %v1802_v7 = vcombine.high %v1757_v61, %v1789_v9  ;;  %v2141_v1 = vsel %vm2077_vm8, %v1938_v17, -inf  ;;  %v1932_v29 = vrot.slane %v1918_v27, %v4124_v24 }
 0x2a5   : > { %v2114_v11 = vsel %vm2077_vm8, %v1801_v57, -inf  ;;  %v1667_v50 = vcombine.low %v1628_v34, %v1660_v59  ;;  %v1900_v5 = vrot.slane %v1886_v48, %v4124_v24  ;;  %v1750_v45 = vcombine.high %v1684_v53, %v1700_v38 }
 0x2a6   : > { %v2162_v19 = vsel %vm2077_vm8, %v2073_v10, -inf  ;;  %v2117_v35 = vsel %vm2077_vm8, %v1802_v7, -inf  ;;  %v2074_v44 = vcombine.high %v2029_v14, %v2061_v36  ;;  %v1796_v60 = vrot.slane %v1782_v63, %v4124_v24 }
 0x2a7   : > { %v2096_v54 = vsel %vm2077_vm8, %v1667_v50, -inf  ;;  %v1939_v2 = vcombine.low %v1900_v5, %v1932_v29  ;;  %v1764_v51 = vrot.slane %v1750_v45, %v4124_v24  ;;  %v1668_v46 = vcombine.high %v1628_v34, %v1660_v59 }
 0x2a8   : > { %2091 = vmax.xlane.f32.xlu1 %v2090_v33  ;;  %2112 = vmax.xlane.f32.xlu0 %v2111_v55  ;;  %v2165_v27 = vsel %vm2077_vm8, %v2074_v44, -inf  ;;  %v1940_v62 = vcombine.high %v1900_v5, %v1932_v29  ;;  %v2075_v23 = vcombine.low %v4559_v58, %v4562_v26  ;;  %v5151_v25 = vlaneseq }
 0x2a9   : > { %v2144_v32 = vsel %vm2077_vm8, %v1939_v2, -inf  ;;  %v1803_v22 = vcombine.low %v1764_v51, %v1796_v60  ;;  %v2099_v40 = vsel %vm2077_vm8, %v1668_v46, -inf  ;;  %v1804_v63 = vcombine.high %v1764_v51, %v1796_v60 }
 0x2aa   : > { %v2147_v24 = vsel %vm2077_vm8, %v1940_v62, -inf  ;;  %v2168_v15 = vsel %vm2077_vm8, %v2075_v23, -inf  ;;  %v2207_v49 = vand.u32 127, %v5151_v25 }
 0x2ab   : > { %v2120_v30 = vsel %vm2077_vm8, %v1803_v22, -inf  ;;  %v2123_v43 = vsel %vm2077_vm8, %v1804_v63, -inf }
 0x2ac   : > { %2139 = vmax.xlane.f32.xlu1 %v2138_v39  ;;  %2160 = vmax.xlane.f32.xlu0 %v2159_v28  ;;  %v4664_v52 = vsub.s32 %v2207_v49, %v5152_v18 }
 0x2b0   : > { %2094 = vmax.xlane.f32.xlu1 %v2093_v42  ;;  %2115 = vmax.xlane.f32.xlu0 %v2114_v11 }
 0x2b4   : > { %2142 = vmax.xlane.f32.xlu1 %v2141_v1  ;;  %2163 = vmax.xlane.f32.xlu0 %v2162_v19 }
 0x2b8   : > { %2097 = vmax.xlane.f32.xlu1 %v2096_v54  ;;  %2118 = vmax.xlane.f32.xlu0 %v2117_v35 }
 0x2bc   : > { %2145 = vmax.xlane.f32.xlu1 %v2144_v32  ;;  %2166 = vmax.xlane.f32.xlu0 %v2165_v27 }
 0x2c0   : > { %2100 = vmax.xlane.f32.xlu1 %v2099_v40  ;;  %2121 = vmax.xlane.f32.xlu0 %v2120_v30 }
 0x2c4   : > { %2148 = vmax.xlane.f32.xlu1 %v2147_v24  ;;  %2169 = vmax.xlane.f32.xlu0 %v2168_v15 }
 0x2c8   : > { %2124 = vmax.xlane.f32.xlu0 %v2123_v43 }
 0x2cc   : > { %2172 = vmax.xlane.f32.xlu0 %v4585_v41 }
 0x319   : > { %v2083_v31 = vpop.xlane.xlu1 %2082  ;;  %v2080_v56 = vpop.xlane.xlu0 %2079 }
 0x31a   : > { %v2215_v57 = vrot.slane %v2083_v31, %v4664_v52  ;;  %v2211_v36 = vrot.slane %v2080_v56, %v4664_v52 }
 0x31c   : > { %v2336_v10 = vsel %vm1047_vm1, %v2215_v57, %v2211_v36 }
 0x31d   : > { %v2128_v4 = vpop.xlane.xlu1 %2127  ;;  %v2104_v3 = vpop.xlane.xlu0 %2103 }
 0x31e   : > { %v2275_v19 = vrot.slane %v2128_v4, %v4664_v52  ;;  %v2243_v5 = vrot.slane %v2104_v3, %v4664_v52 }
 0x321   : > { %v4646_v38 = vpop.xlane.xlu1 %2151  ;;  %v2107_v58 = vpop.xlane.xlu0 %2106 }
 0x322   : > { %v2247_v45 = vrot.slane %v2107_v58, %v4664_v52 }
 0x324   : > { %v2343_v15 = vsel %vm1047_vm1, %v2247_v45, %v2243_v5 }
 0x325   : > { %v2086_v26 = vpop.xlane.xlu1 %2085  ;;  %v2131_v6 = vpop.xlane.xlu0 %2130 }
 0x326   : > { %v2219_v14 = vrot.slane %v2086_v26, %v4664_v52  ;;  %v2279_v59 = vrot.slane %v2131_v6, %v4664_v52 }
 0x328   : > { %v2337_v48 = vsel %vm1050_vm2, %v2219_v14, %v2336_v10  ;;  %v2350_v60 = vsel %vm1047_vm1, %v2279_v59, %v2275_v19 }
 0x329   : > { %v2134_v8 = vpop.xlane.xlu1 %2133  ;;  %v4648_v53 = vpop.xlane.xlu0 %2154 }
 0x32a   : > { %v2283_v7 = vrot.slane %v2134_v8, %v4664_v52  ;;  %v2311_v4 = vrot.slane %v4648_v53, %v4664_v52 }
 0x32c   : > { %v2351_v46 = vsel %vm1050_vm2, %v2283_v7, %v2350_v60 }
 0x32d   : > { %v2089_v20 = vpop.xlane.xlu1 %2088  ;;  %v4650_v16 = vpop.xlane.xlu0 %2109 }
 0x32e   : > { %v2223_v0 = vrot.slane %v2089_v20, %v4664_v52  ;;  %v2251_v22 = vrot.slane %v4650_v16, %v4664_v52 }
 0x330   : > { %v2338_v50 = vsel %vm1053_vm3, %v2223_v0, %v2337_v48  ;;  %v2344_v6 = vsel %vm1050_vm2, %v2251_v22, %v2343_v15 }
 0x331   : > { %v2137_v12 = vpop.xlane.xlu1 %2136  ;;  %v4652_v13 = vpop.xlane.xlu0 %2157 }
 0x332   : > { %v2287_v29 = vrot.slane %v2137_v12, %v4664_v52  ;;  %v2315_v8 = vrot.slane %v4652_v13, %v4664_v52  ;;  %v2307_v12 = vrot.slane %v4646_v38, %v4664_v52 }
 0x334   : > { %v2352_v62 = vsel %vm1053_vm3, %v2287_v29, %v2351_v46 }
 0x335   : > { %v2092_v37 = vpop.xlane.xlu1 %2091  ;;  %v4654_v41 = vpop.xlane.xlu0 %2112 }
 0x336   : > { %v2227_v42 = vrot.slane %v2092_v37, %v4664_v52  ;;  %v2255_v23 = vrot.slane %v4654_v41, %v4664_v52 }
 0x338   : > { %v2339_v35 = vsel %vm1056_vm4, %v2227_v42, %v2338_v50  ;;  %v2345_v53 = vsel %vm1053_vm3, %v2255_v23, %v2344_v6 }
 0x339   : > { %v2140_v47 = vpop.xlane.xlu1 %2139  ;;  %v4656_v21 = vpop.xlane.xlu0 %2160 }
 0x33a   : > { %v2291_v54 = vrot.slane %v2140_v47, %v4664_v52  ;;  %v2319_v37 = vrot.slane %v4656_v21, %v4664_v52 }
 0x33c   : > { %v2353_v63 = vsel %vm1056_vm4, %v2291_v54, %v2352_v62 }
 0x33d   : > { %v2095_v55 = vpop.xlane.xlu1 %2094  ;;  %v4658_v33 = vpop.xlane.xlu0 %2115 }
 0x33e   : > { %v2231_v34 = vrot.slane %v2095_v55, %v4664_v52  ;;  %v2259_v43 = vrot.slane %v4658_v33, %v4664_v52  ;;  %v2357_v33 = vsel %vm1047_vm1, %v2311_v4, %v2307_v12 }
 0x33f   : > { %v2358_v49 = vsel %vm1050_vm2, %v2315_v8, %v2357_v33 }
 0x340   : > { %v2340_v51 = vsel %vm1059_vm5, %v2231_v34, %v2339_v35  ;;  %v2346_v47 = vsel %vm1056_vm4, %v2259_v43, %v2345_v53  ;;  %v2359_v18 = vsel %vm1053_vm3, %v2319_v37, %v2358_v49 }
 0x341   : > { %v2143_v9 = vpop.xlane.xlu1 %2142  ;;  %v4661_v61 = vpop.xlane.xlu0 %2163 }
 0x342   : > { %v2295_v32 = vrot.slane %v2143_v9, %v4664_v52  ;;  %v2323_v13 = vrot.slane %v4661_v61, %v4664_v52 }
 0x344   : > { %v2354_v3 = vsel %vm1059_vm5, %v2295_v32, %v2353_v63 }
 0x345   : > { %v2098_v39 = vpop.xlane.xlu1 %2097  ;;  %v2119_v28 = vpop.xlane.xlu0 %2118 }
 0x346   : > { %v2235_v1 = vrot.slane %v2098_v39, %v4664_v52  ;;  %v2263_v58 = vrot.slane %v2119_v28, %v4664_v52  ;;  %v2360_v28 = vsel %vm1056_vm4, %v2323_v13, %v2359_v18 }
 0x348   : > { %v2341_v40 = vsel %vm1062_vm6, %v2235_v1, %v2340_v51  ;;  %v2347_v38 = vsel %vm1059_vm5, %v2263_v58, %v2346_v47 }
 0x349   : > { %v2146_v11 = vpop.xlane.xlu1 %2145  ;;  %v4671_v17 = vpop.xlane.xlu0 %2166 }
 0x34a   : > { %v2299_v30 = vrot.slane %v2146_v11, %v4664_v52  ;;  %v2327_v25 = vrot.slane %v4671_v17, %v4664_v52 }
 0x34c   : > { %v2355_v20 = vsel %vm1062_vm6, %v2299_v30, %v2354_v3  ;;  %v2361_v36 = vsel %vm1059_vm5, %v2327_v25, %v2360_v28 }
 0x34d   : > { %v2101_v2 = vpop.xlane.xlu1 %2100  ;;  %v2122_v44 = vpop.xlane.xlu0 %2121 }
 0x34e   : > { %v2239_v27 = vrot.slane %v2101_v2, %v4664_v52  ;;  %v2267_v16 = vrot.slane %v2122_v44, %v4664_v52 }
 0x350   : > { %v2342_v24 = vsel %vm1065_vm7, %v2239_v27, %v2341_v40  ;;  %v2348_v9 = vsel %vm1062_vm6, %v2267_v16, %v2347_v38 }
 0x351   : > { %2369 = vst.msk [vmem:[%s4704_s15] sm:$0xff] %vm2368_vm9, %v2342_v24  ;;  %v2149_v31 = vpop.xlane.xlu1 %2148  ;;  %v2170_v56 = vpop.xlane.xlu0 %2169 }
 0x352   : > { %v2303_v26 = vrot.slane %v2149_v31, %v4664_v52  ;;  %v2331_v61 = vrot.slane %v2170_v56, %v4664_v52 }
 0x354   : > { %v2356_v41 = vsel %vm1065_vm7, %v2303_v26, %v2355_v20  ;;  %v2362_v0 = vsel %vm1062_vm6, %v2331_v61, %v2361_v36 }
 0x355   : > { %2371 = vst.msk [vmem:[%s4704_s15 + $0x10] sm:$0xff] %vm2368_vm9, %v2356_v41  ;;  %v2125_v55 = vpop.xlane.xlu0 %2124 }
 0x356   : > { %v2271_v21 = vrot.slane %v2125_v55, %v4664_v52 }
 0x358   : > { %v2349_v39 = vsel %vm1065_vm7, %v2271_v21, %v2348_v9 }
 0x359   : > { %2370 = vst.msk [vmem:[%s4704_s15 + $0x8] sm:$0xff] %vm2368_vm9, %v2349_v39  ;;  %v2173_v57 = vpop.xlane.xlu0 %2172 }
 0x35a   : > { %v2335_v14 = vrot.slane %v2173_v57, %v4664_v52 }
 0x35c   : > { %v2363_v42 = vsel %vm1065_vm7, %v2335_v14, %v2362_v0 }
 0x35d   : > { %2372 = vst.msk [vmem:[%s4704_s15 + $0x18] sm:$0xff] %vm2368_vm9, %v2363_v42 }
 0x35e   : > { %2619 = shalt.err (!%p2616_p5)
}
 0x35f   : > { %s2620_s18 = scalar_lea.hbm %s4751_s23, 512  ;;  %s2624_s30 = scalar_lea.hbm %s4805_s1, 1024 }
 0x360   : > { %p2621_p4 = scmp.ne.s32.totalorder %s4751_s23, %s2620_s18  ;;  %p2625_p12 = scmp.lt.u32.totalorder %s4751_s23, %s4805_s1 }
 0x361   : > { %p2626_p1 = scmp.lt.u32.totalorder %s2624_s30, %s2620_s18  ;;  %p2628_p8 = scmp.lt.u32.totalorder %s2620_s18, %s4751_s23 }
 0x362   : > { %p2622_p7 = pnand %p2621_p4, %p5153_p9 }
 0x363   : > { %p2627_p3 = por %p2626_p1, %p2625_p12 }
 0x364   : > { %p2623_p10 = pneg %p2622_p7 }
 0x365   : > { %p2629_p11 = por %p2628_p8, %p2627_p3 }
 0x367   : > { %p2630_p0 = pnand %p2629_p11, %p2623_p10 }
 0x369   : > { %2633 = shalt.err (!%p2630_p0)
}
 0x36a   : > { %s2703_s12 = smov 128   ;;  %s2704_s13 = smov 8  }
 0x36b   : > { %2495 = dma.vmem_to_hbm [thread:$0]  (%p5153_p9), %s4742_s16, 512, %s4751_s23, %s2374_s24, %s2703_s12, %s2703_s12, %s2704_s13  }
 0x36c PF: > { %s2403_s15 = sand.u32 1, %s2668_s6   ;;  %p5154_p6 = scmp.ne.s32.totalorder %s4830_s21, 0 }
 0x36d   : > { %p5155_p13 = scmp.ge.s32.totalorder %s2688_s11, 2  ;;  %s2404_s17 = scalar_lea.sflag [#allocation4], %s2403_s15 }
 0x36f   : > { %p2502_p2 = pnand %p5155_p13, %p5154_p6 }
 0x371   : > { %2663 = dma.done.wait (!%p2502_p2), %s2404_s17, 512  }
 0x372   : > { %2665 = vsyncadd (!%p2502_p2), %s2404_s17, 4294966784  ;;  %s17_s11 = sadd.s32 1, %s2688_s11   ;;  %s5156_s6 = smov %s2672_s7 }
 0x373   : > { %p14_p5 = scmp.ge.s32.totalorder %s17_s11, 4   ;;  %s5157_s7 = smov %s2676_s8 }
 0x374   : > { %s5158_s8 = smov %s2771_s20  ;;  %s5159_s9 = smov %s2684_s10 }
 0x375   : > { %s5160_s10 = smov %s5162_s14  ;;  %16 = sbr.rel (!%p14_p5) target bundleno = 6 (0x6), region = 69 }
 0x37c   :  { %2409 = vsyncpa [#allocation3], 1 }
 0x37d   :  { %2411 = vsyncpa [#allocation3 + $0x1], 1 }
 0x37e   :  { %2412 = vsyncpa [#allocation4], 1 }
 0x37f   :  { %2414 = vsyncpa [#allocation4 + $0x1], 1 }

</bundles_post_ra>
